<compile_context>
chip_gen: v7x
topology: tpu7x:2x2x1
jax: 0.10.0
libtpu: 0.0.40
codegen_flags: <defaults>
</compile_context>

<pallas_src>
import functools

import numpy as np
import jax
import jax.numpy as jnp
from jax.experimental import pallas as pl
from jax.experimental.pallas import tpu as pltpu

EPS = 1e-5  # torch nn.LayerNorm default eps


def _layer_norm(x, g, b):
    mu = jnp.mean(x, axis=-1, keepdims=True)
    var = jnp.mean(jnp.square(x - mu), axis=-1, keepdims=True)
    return (x - mu) * jax.lax.rsqrt(var + EPS) * g + b


# ------------------------------ fused SAB block --------------------------------
def _sab_block(x, tag, P, num_heads, bias):
    N, D = x.shape
    H = num_heads
    p = D // H
    scale = 1.0 / float(p) ** 0.5

    # ONE flat matmul for q/k/v (wqkv is (D, 3D) = wq|wk|wv); split afterwards.
    qkv = jnp.dot(x, P(tag + "_wqkv"),
                  preferred_element_type=jnp.float32) + P(tag + "_bqkv")      # (N, 3D)
    q, k, v = qkv[:, :D], qkv[:, D:2 * D], qkv[:, 2 * D:]

    # head split: head h owns lane columns [h*p, (h+1)*p)
    qh = jnp.transpose(q.reshape(N, H, p), (1, 0, 2))                          # (H, N, p)
    kh = jnp.transpose(k.reshape(N, H, p), (1, 0, 2))
    vh = jnp.transpose(v.reshape(N, H, p), (1, 0, 2))

    s = jnp.einsum("hnp,hmp->hnm", qh, kh,
                   preferred_element_type=jnp.float32) * scale                 # (H, N, N)
    if bias is not None:
        s = s + bias
    s = s - jnp.max(s, axis=-1, keepdims=True)
    e = jnp.exp(s)
    attn = e / jnp.sum(e, axis=-1, keepdims=True)          # exact divide (torch.softmax parity)
    oh = jnp.einsum("hnm,hmp->hnp", attn, vh,
                    preferred_element_type=jnp.float32)                         # (H, N, p)

    # concat heads back along lanes, then ONE (N,D) @ Wo(D,D) projection.
    o = jnp.transpose(oh, (1, 0, 2)).reshape(N, D)
    o = jnp.dot(o, P(tag + "_wo"), preferred_element_type=jnp.float32) + P(tag + "_bo")

    h1 = _layer_norm(x + o, P(tag + "_ln1g"), P(tag + "_ln1b"))                # residual + LN1
    r = jnp.maximum(jnp.dot(h1, P(tag + "_r1w"),
                            preferred_element_type=jnp.float32) + P(tag + "_r1b"), 0.0)
    r = jnp.maximum(jnp.dot(r, P(tag + "_r2w"),
                            preferred_element_type=jnp.float32) + P(tag + "_r2b"), 0.0)
    r = jnp.maximum(jnp.dot(r, P(tag + "_r3w"),
                            preferred_element_type=jnp.float32) + P(tag + "_r3b"), 0.0)
    return _layer_norm(h1 + r, P(tag + "_ln2g"), P(tag + "_ln2b"))             # residual + LN2


# ----------------------------- fused encoder kernel ----------------------------
def encoder_kernel(obs_ref, slab_ref, out_ref, *, layout, num_heads,
                   num_objects, sets_per_block):
    def P(name):
        off, r, c = layout[name]            # static python ints -> static slice
        return slab_ref[off:off + r, :c]

    # ---- MLPBase: LN(obs) -> [Linear+ReLU+LN] x 2 ----
    x = _layer_norm(obs_ref[...], P("ln0g"), P("ln0b"))
    x = jnp.maximum(jnp.dot(x, P("w1"), preferred_element_type=jnp.float32) + P("b1"), 0.0)
    x = _layer_norm(x, P("ln1g"), P("ln1b"))
    x = jnp.maximum(jnp.dot(x, P("w2"), preferred_element_type=jnp.float32) + P("b2"), 0.0)
    x = _layer_norm(x, P("ln2g"), P("ln2b"))

    # ---- block-diagonal attention bias, only if a block packs >1 set; built
    #      in-kernel from iotas (no O(M^2) HBM input). ----
    M = x.shape[0]
    if sets_per_block > 1:
        rid = jax.lax.broadcasted_iota(jnp.int32, (M, M), 0) // num_objects
        cid = jax.lax.broadcasted_iota(jnp.int32, (M, M), 1) // num_objects
        bias = jnp.where(rid == cid, 0.0, -1e9).astype(jnp.float32)
    else:
        bias = None

    # ---- SAB blocks ----
    z = _sab_block(x, "sab1", P, num_heads, bias)      # (M, D)  == returned `z`
    y = _sab_block(z, "sab2", P, num_heads, bias)      # (M, D)

    # ---- ACTLayer (Discrete, deterministic): computed for every row; the
    #      wrapper keeps only the first num_agents rows of each set. ----
    logits = jnp.dot(y, P("act_w"), preferred_element_type=jnp.float32) + P("act_b")
    m = jnp.max(logits, axis=-1, keepdims=True)
    lse = jnp.log(jnp.sum(jnp.exp(logits - m), axis=-1, keepdims=True)) + m
    n_act = logits.shape[-1]
    col = jax.lax.broadcasted_iota(jnp.int32, logits.shape, 1)
    # first maximal index == torch.argmax tie-breaking; log_prob(argmax) = m - lse
    amax = jnp.min(jnp.where(logits == m, col, n_act), axis=-1, keepdims=True)
    logp = m - lse

    # ---- lane-dense packed output via direct sub-ref stores (no lane concat) ----
    D = y.shape[1]
    out_ref[:, :D] = z
    out_ref[:, D:D + 1] = amax.astype(jnp.float32)   # int->f32 exact while act_dim < 2^24
    out_ref[:, D + 1:D + 2] = logp
    out_ref[:, D + 2:] = jnp.zeros((M, out_ref.shape[1] - D - 2), jnp.float32)


# ----------------------------------- wrapper -----------------------------------
def _sets_per_block(num_sets, num_objects):
    # One set per grid step keeps attention scores at (H, N, N) and VMEM O(N^2)
    # regardless of batch size; group just enough sets to satisfy the 8-row
    # sublane alignment when N is not a multiple of 8.
    for g in range(1, num_sets + 1):
        if num_sets % g == 0 and (g * num_objects) % 8 == 0:
            return g
    return num_sets   # single full block (always layout-legal)


def encoder_forward(param_slab, param_layout, obs, rnn_states, masks, *,
                    num_agents, num_objects, hidden_size, n_head):
    rows, obs_dim = obs.shape
    assert rows % num_objects == 0
    num_sets = rows // num_objects
    D = hidden_size
    pack_w = 128                                  # lane-dense output slab width

    spb = _sets_per_block(num_sets, num_objects)
    rows_per_block = spb * num_objects
    grid = (num_sets // spb,)

    kernel = functools.partial(
        encoder_kernel, layout=param_layout, num_heads=n_head,
        num_objects=num_objects, sets_per_block=spb)

    packed = pl.pallas_call(
        kernel,
        out_shape=jax.ShapeDtypeStruct((rows, pack_w), jnp.float32),
        grid=grid,
        in_specs=[
            pl.BlockSpec((rows_per_block, obs_dim), lambda b: (b, 0)),
            pl.BlockSpec(param_slab.shape, lambda b: (0, 0)),   # resident weights
        ],
        out_specs=pl.BlockSpec((rows_per_block, pack_w), lambda b: (b, 0)),
        compiler_params=pltpu.CompilerParams(
            dimension_semantics=("parallel",)),   # sets are independent -> megacore/2-TC
    )(obs, param_slab)

    z = packed[:, :D].reshape(num_sets, num_objects, D)
    per_set = packed.reshape(num_sets, num_objects, pack_w)[:, :num_agents]
    actions = per_set[..., D].reshape(-1, 1).astype(jnp.int32)
    action_log_probs = per_set[..., D + 1].reshape(-1, 1)
    # use_recurrent_policy = 0  ->  RNN skipped, rnn_states returned unchanged
    return actions, action_log_probs, rnn_states, z


# ------------------------------ parameter setup --------------------------------
def _linear(key, din, dout, w_scale=0.1):
    kw, kb = jax.random.split(key)
    w = jax.random.normal(kw, (din, dout), jnp.float32) * w_scale
    b = jax.random.normal(kb, (1, dout), jnp.float32) * 0.01
    return w, b


def _ln_params(d):
    return jnp.ones((1, d), jnp.float32), jnp.zeros((1, d), jnp.float32)


def _sab_params(key, d):
    ks = jax.random.split(key, 7)
    wq, bq = _linear(ks[0], d, d)
    wk, bk = _linear(ks[1], d, d)
    wv, bv = _linear(ks[2], d, d)
    wo, bo = _linear(ks[3], d, d)
    r1w, r1b = _linear(ks[4], d, d)
    r2w, r2b = _linear(ks[5], d, d)
    r3w, r3b = _linear(ks[6], d, d)
    ln1g, ln1b = _ln_params(d)
    ln2g, ln2b = _ln_params(d)
    return dict(wq=wq, bq=bq, wk=wk, bk=bk, wv=wv, bv=bv, wo=wo, bo=bo,
                ln1g=ln1g, ln1b=ln1b, ln2g=ln2g, ln2b=ln2b,
                r1w=r1w, r1b=r1b, r2w=r2w, r2b=r2b, r3w=r3w, r3b=r3b)


def init_params(key, obs_dim, hidden, act_dim):
    k_base1, k_base2, k_sab1, k_sab2, k_act = jax.random.split(key, 5)
    w1, b1 = _linear(k_base1, obs_dim, hidden)
    w2, b2 = _linear(k_base2, hidden, hidden)
    ln0g, ln0b = _ln_params(obs_dim)
    ln1g, ln1b = _ln_params(hidden)
    ln2g, ln2b = _ln_params(hidden)
    base = dict(ln0g=ln0g, ln0b=ln0b, w1=w1, b1=b1, ln1g=ln1g, ln1b=ln1b,
                w2=w2, b2=b2, ln2g=ln2g, ln2b=ln2b)
    wa, ba = _linear(k_act, hidden, act_dim)
    return dict(base=base,
                sab1=_sab_params(k_sab1, hidden),
                sab2=_sab_params(k_sab2, hidden),
                act=dict(w=wa, b=ba))


def pack_params(params):
    """Host-side one-time repack of ALL Encoder parameters into one lane-dense
    (R, 128) f32 slab (a single DMA; no per-bias (8,128) padding tiles).
    Each parameter starts at an 8-aligned row; returns (slab, layout) where
    layout[name] = (row_offset, rows, cols) used as static slices in-kernel."""
    def as2d(a):
        a = np.asarray(a, np.float32)
        return a if a.ndim == 2 else a.reshape(1, -1)

    entries = []
    base = params["base"]
    for name in ("ln0g", "ln0b", "w1", "b1", "ln1g", "ln1b", "w2", "b2", "ln2g", "ln2b"):
        entries.append((name, as2d(base[name])))
    for tag in ("sab1", "sab2"):
        sp = params[tag]
        wqkv = np.concatenate([as2d(sp["wq"]), as2d(sp["wk"]), as2d(sp["wv"])], axis=1)
        bqkv = np.concatenate([as2d(sp["bq"]), as2d(sp["bk"]), as2d(sp["bv"])], axis=1)
        entries.append((f"{tag}_wqkv", wqkv))          # (D, 3D) flat QKV weight
        entries.append((f"{tag}_bqkv", bqkv))          # (1, 3D)
        for name in ("wo", "bo", "ln1g", "ln1b", "r1w", "r1b", "r2w", "r2b",
                     "r3w", "r3b", "ln2g", "ln2b"):
            entries.append((f"{tag}_{name}", as2d(sp[name])))
    entries.append(("act_w", as2d(params["act"]["w"])))
    entries.append(("act_b", as2d(params["act"]["b"])))

    layout = {}
    off = 0
    for name, a in entries:
        r, c = a.shape
        assert c <= 128, f"{name} wider than 128 lanes; widen the slab packing"
        layout[name] = (off, r, c)
        off += -(-r // 8) * 8                          # 8-aligned row blocks
    slab = np.zeros((off, 128), np.float32)
    for name, a in entries:
        o, r, c = layout[name]
        slab[o:o + r, :c] = a
    return jnp.asarray(slab), layout


if __name__ == "__main__":
    # config (mirrors Encoder.__init__ args)
    num_agents = 3
    num_objects = 8
    hidden_size = 32
    n_head = 4
    obs_dim = 16
    act_dim = 5
    recurrent_N = 1
    n_env = 2                     # obs rows = n_env * num_objects

    key = jax.random.PRNGKey(0)
    k_param, k_obs = jax.random.split(key)
    params = init_params(k_param, obs_dim, hidden_size, act_dim)
    param_slab, param_layout = pack_params(params)

    rows = n_env * num_objects
    obs = jax.random.normal(k_obs, (rows, obs_dim), jnp.float32)
    rnn_states = jnp.zeros((rows, recurrent_N, hidden_size), jnp.float32)
    masks = jnp.ones((rows, 1), jnp.float32)

    actions, action_log_probs, rnn_states_out, z = encoder_forward(
        param_slab, param_layout, obs, rnn_states, masks,
        num_agents=num_agents, num_objects=num_objects,
        hidden_size=hidden_size, n_head=n_head)

    jax.block_until_ready((actions, action_log_probs, rnn_states_out, z))
    assert actions.shape == (n_env * num_agents, 1) and actions.dtype == jnp.int32
    assert action_log_probs.shape == (n_env * num_agents, 1)
    assert z.shape == (n_env, num_objects, hidden_size)
    assert rnn_states_out.shape == rnn_states.shape
    print("KERNEL_OK")
</pallas_src>

<mosaic_0001>
module attributes {stable_mosaic.version = 11 : i64} {
  func.func @encoder_kernel(%arg0: i32, %arg1: memref<8x16xf32, #tpu.memory_space<vmem>>, %arg2: memref<616x128xf32, #tpu.memory_space<vmem>>, %arg3: memref<8x128xf32, #tpu.memory_space<vmem>>) attributes {dimension_semantics = [#tpu.dimension_semantics<parallel>], iteration_bounds = array<i64: 2>, scalar_prefetch = 0 : i64, scratch_operands = 0 : i64, tpu.core_type = #tpu.core_type<tc>, window_params = [{transform_indices = @transform_0, window_bounds = array<i64: 8, 16>}, {pipeline_mode = #tpu.pipeline_mode<synchronous>, transform_indices = @transform_1, window_bounds = array<i64: 616, 128>}, {transform_indices = @transform_2, window_bounds = array<i64: 8, 128>}]} {
    %c0 = arith.constant 0 : index
    %c0_0 = arith.constant 0 : index
    %0 = vector.load %arg1[%c0, %c0_0] : memref<8x16xf32, #tpu.memory_space<vmem>>, vector<8x16xf32>
    %c0_1 = arith.constant 0 : index
    %c0_2 = arith.constant 0 : index
    %1 = vector.load %arg2[%c0_1, %c0_2] : memref<616x128xf32, #tpu.memory_space<vmem>>, vector<1x16xf32>
    %c8 = arith.constant 8 : index
    %c0_3 = arith.constant 0 : index
    %2 = vector.load %arg2[%c8, %c0_3] : memref<616x128xf32, #tpu.memory_space<vmem>>, vector<1x16xf32>
    %cst = arith.constant dense<0.000000e+00> : vector<8xf32>
    %3 = vector.multi_reduction <add>, %0, %cst [1] : vector<8x16xf32> to vector<8xf32>
    %4 = vector.shape_cast %3 : vector<8xf32> to vector<8x1xf32>
    %cst_4 = arith.constant 1.600000e+01 : f32
    %5 = vector.broadcast %cst_4 : f32 to vector<8x1xf32>
    %6 = arith.divf %4, %5 : vector<8x1xf32>
    %7 = vector.broadcast %6 : vector<8x1xf32> to vector<8x16xf32>
    %8 = arith.subf %0, %7 : vector<8x16xf32>
    %9 = arith.mulf %8, %8 : vector<8x16xf32>
    %cst_5 = arith.constant dense<0.000000e+00> : vector<8xf32>
    %10 = vector.multi_reduction <add>, %9, %cst_5 [1] : vector<8x16xf32> to vector<8xf32>
    %11 = vector.shape_cast %10 : vector<8xf32> to vector<8x1xf32>
    %cst_6 = arith.constant 1.600000e+01 : f32
    %12 = vector.broadcast %cst_6 : f32 to vector<8x1xf32>
    %13 = arith.divf %11, %12 : vector<8x1xf32>
    %14 = vector.broadcast %6 : vector<8x1xf32> to vector<8x16xf32>
    %15 = arith.subf %0, %14 : vector<8x16xf32>
    %cst_7 = arith.constant 9.99999974E-6 : f32
    %16 = vector.broadcast %cst_7 : f32 to vector<8x1xf32>
    %17 = arith.addf %13, %16 : vector<8x1xf32>
    %18 = math.rsqrt %17 : vector<8x1xf32>
    %19 = vector.broadcast %18 : vector<8x1xf32> to vector<8x16xf32>
    %20 = arith.mulf %15, %19 : vector<8x16xf32>
    %21 = vector.broadcast %1 : vector<1x16xf32> to vector<8x16xf32>
    %22 = arith.mulf %20, %21 : vector<8x16xf32>
    %23 = vector.broadcast %2 : vector<1x16xf32> to vector<8x16xf32>
    %24 = arith.addf %22, %23 : vector<8x16xf32>
    %c16 = arith.constant 16 : index
    %c0_8 = arith.constant 0 : index
    %25 = vector.load %arg2[%c16, %c0_8] : memref<616x128xf32, #tpu.memory_space<vmem>>, vector<16x32xf32>
    %cst_9 = arith.constant dense<0.000000e+00> : vector<8x32xf32>
    %26 = tpu.matmul %24, %25, %cst_9 {dimension_numbers = #tpu.dot_dimension_numbers<[1], [0], [0], [1], [0, 0, 1, 1], [], []>} : vector<8x16xf32>, vector<16x32xf32>, vector<8x32xf32> -> vector<8x32xf32>
    %c32 = arith.constant 32 : index
    %c0_10 = arith.constant 0 : index
    %27 = vector.load %arg2[%c32, %c0_10] : memref<616x128xf32, #tpu.memory_space<vmem>>, vector<1x32xf32>
    %28 = vector.broadcast %27 : vector<1x32xf32> to vector<8x32xf32>
    %29 = arith.addf %26, %28 : vector<8x32xf32>
    %cst_11 = arith.constant 0.000000e+00 : f32
    %30 = vector.broadcast %cst_11 : f32 to vector<8x32xf32>
    %31 = arith.maximumf %29, %30 : vector<8x32xf32>
    %c40 = arith.constant 40 : index
    %c0_12 = arith.constant 0 : index
    %32 = vector.load %arg2[%c40, %c0_12] : memref<616x128xf32, #tpu.memory_space<vmem>>, vector<1x32xf32>
    %c48 = arith.constant 48 : index
    %c0_13 = arith.constant 0 : index
    %33 = vector.load %arg2[%c48, %c0_13] : memref<616x128xf32, #tpu.memory_space<vmem>>, vector<1x32xf32>
    %cst_14 = arith.constant dense<0.000000e+00> : vector<8xf32>
    %34 = vector.multi_reduction <add>, %31, %cst_14 [1] : vector<8x32xf32> to vector<8xf32>
    %35 = vector.shape_cast %34 : vector<8xf32> to vector<8x1xf32>
    %cst_15 = arith.constant 3.200000e+01 : f32
    %36 = vector.broadcast %cst_15 : f32 to vector<8x1xf32>
    %37 = arith.divf %35, %36 : vector<8x1xf32>
    %38 = vector.broadcast %37 : vector<8x1xf32> to vector<8x32xf32>
    %39 = arith.subf %31, %38 : vector<8x32xf32>
    %40 = arith.mulf %39, %39 : vector<8x32xf32>
    %cst_16 = arith.constant dense<0.000000e+00> : vector<8xf32>
    %41 = vector.multi_reduction <add>, %40, %cst_16 [1] : vector<8x32xf32> to vector<8xf32>
    %42 = vector.shape_cast %41 : vector<8xf32> to vector<8x1xf32>
    %cst_17 = arith.constant 3.200000e+01 : f32
    %43 = vector.broadcast %cst_17 : f32 to vector<8x1xf32>
    %44 = arith.divf %42, %43 : vector<8x1xf32>
    %45 = vector.broadcast %37 : vector<8x1xf32> to vector<8x32xf32>
    %46 = arith.subf %31, %45 : vector<8x32xf32>
    %cst_18 = arith.constant 9.99999974E-6 : f32
    %47 = vector.broadcast %cst_18 : f32 to vector<8x1xf32>
    %48 = arith.addf %44, %47 : vector<8x1xf32>
    %49 = math.rsqrt %48 : vector<8x1xf32>
    %50 = vector.broadcast %49 : vector<8x1xf32> to vector<8x32xf32>
    %51 = arith.mulf %46, %50 : vector<8x32xf32>
    %52 = vector.broadcast %32 : vector<1x32xf32> to vector<8x32xf32>
    %53 = arith.mulf %51, %52 : vector<8x32xf32>
    %54 = vector.broadcast %33 : vector<1x32xf32> to vector<8x32xf32>
    %55 = arith.addf %53, %54 : vector<8x32xf32>
    %c56 = arith.constant 56 : index
    %c0_19 = arith.constant 0 : index
    %56 = vector.load %arg2[%c56, %c0_19] : memref<616x128xf32, #tpu.memory_space<vmem>>, vector<32x32xf32>
    %cst_20 = arith.constant dense<0.000000e+00> : vector<8x32xf32>
    %57 = tpu.matmul %55, %56, %cst_20 {dimension_numbers = #tpu.dot_dimension_numbers<[1], [0], [0], [1], [0, 0, 1, 1], [], []>} : vector<8x32xf32>, vector<32x32xf32>, vector<8x32xf32> -> vector<8x32xf32>
    %c88 = arith.constant 88 : index
    %c0_21 = arith.constant 0 : index
    %58 = vector.load %arg2[%c88, %c0_21] : memref<616x128xf32, #tpu.memory_space<vmem>>, vector<1x32xf32>
    %59 = vector.broadcast %58 : vector<1x32xf32> to vector<8x32xf32>
    %60 = arith.addf %57, %59 : vector<8x32xf32>
    %cst_22 = arith.constant 0.000000e+00 : f32
    %61 = vector.broadcast %cst_22 : f32 to vector<8x32xf32>
    %62 = arith.maximumf %60, %61 : vector<8x32xf32>
    %c96 = arith.constant 96 : index
    %c0_23 = arith.constant 0 : index
    %63 = vector.load %arg2[%c96, %c0_23] : memref<616x128xf32, #tpu.memory_space<vmem>>, vector<1x32xf32>
    %c104 = arith.constant 104 : index
    %c0_24 = arith.constant 0 : index
    %64 = vector.load %arg2[%c104, %c0_24] : memref<616x128xf32, #tpu.memory_space<vmem>>, vector<1x32xf32>
    %cst_25 = arith.constant dense<0.000000e+00> : vector<8xf32>
    %65 = vector.multi_reduction <add>, %62, %cst_25 [1] : vector<8x32xf32> to vector<8xf32>
    %66 = vector.shape_cast %65 : vector<8xf32> to vector<8x1xf32>
    %cst_26 = arith.constant 3.200000e+01 : f32
    %67 = vector.broadcast %cst_26 : f32 to vector<8x1xf32>
    %68 = arith.divf %66, %67 : vector<8x1xf32>
    %69 = vector.broadcast %68 : vector<8x1xf32> to vector<8x32xf32>
    %70 = arith.subf %62, %69 : vector<8x32xf32>
    %71 = arith.mulf %70, %70 : vector<8x32xf32>
    %cst_27 = arith.constant dense<0.000000e+00> : vector<8xf32>
    %72 = vector.multi_reduction <add>, %71, %cst_27 [1] : vector<8x32xf32> to vector<8xf32>
    %73 = vector.shape_cast %72 : vector<8xf32> to vector<8x1xf32>
    %cst_28 = arith.constant 3.200000e+01 : f32
    %74 = vector.broadcast %cst_28 : f32 to vector<8x1xf32>
    %75 = arith.divf %73, %74 : vector<8x1xf32>
    %76 = vector.broadcast %68 : vector<8x1xf32> to vector<8x32xf32>
    %77 = arith.subf %62, %76 : vector<8x32xf32>
    %cst_29 = arith.constant 9.99999974E-6 : f32
    %78 = vector.broadcast %cst_29 : f32 to vector<8x1xf32>
    %79 = arith.addf %75, %78 : vector<8x1xf32>
    %80 = math.rsqrt %79 : vector<8x1xf32>
    %81 = vector.broadcast %80 : vector<8x1xf32> to vector<8x32xf32>
    %82 = arith.mulf %77, %81 : vector<8x32xf32>
    %83 = vector.broadcast %63 : vector<1x32xf32> to vector<8x32xf32>
    %84 = arith.mulf %82, %83 : vector<8x32xf32>
    %85 = vector.broadcast %64 : vector<1x32xf32> to vector<8x32xf32>
    %86 = arith.addf %84, %85 : vector<8x32xf32>
    %c112 = arith.constant 112 : index
    %c0_30 = arith.constant 0 : index
    %87 = vector.load %arg2[%c112, %c0_30] : memref<616x128xf32, #tpu.memory_space<vmem>>, vector<32x96xf32>
    %cst_31 = arith.constant dense<0.000000e+00> : vector<8x96xf32>
    %88 = tpu.matmul %86, %87, %cst_31 {dimension_numbers = #tpu.dot_dimension_numbers<[1], [0], [0], [1], [0, 0, 1, 1], [], []>} : vector<8x32xf32>, vector<32x96xf32>, vector<8x96xf32> -> vector<8x96xf32>
    %c144 = arith.constant 144 : index
    %c0_32 = arith.constant 0 : index
    %89 = vector.load %arg2[%c144, %c0_32] : memref<616x128xf32, #tpu.memory_space<vmem>>, vector<1x96xf32>
    %90 = vector.broadcast %89 : vector<1x96xf32> to vector<8x96xf32>
    %91 = arith.addf %88, %90 : vector<8x96xf32>
    %92 = vector.extract_strided_slice %91 {offsets = [0, 0], sizes = [8, 32], strides = [1, 1]} : vector<8x96xf32> to vector<8x32xf32>
    %93 = vector.extract_strided_slice %91 {offsets = [0, 32], sizes = [8, 32], strides = [1, 1]} : vector<8x96xf32> to vector<8x32xf32>
    %94 = vector.extract_strided_slice %91 {offsets = [0, 64], sizes = [8, 32], strides = [1, 1]} : vector<8x96xf32> to vector<8x32xf32>
    %95 = vector.shape_cast %92 : vector<8x32xf32> to vector<8x4x8xf32>
    %96 = tpu.transpose %95, [1, 0, 2] : vector<8x4x8xf32> -> vector<4x8x8xf32>
    %97 = vector.shape_cast %93 : vector<8x32xf32> to vector<8x4x8xf32>
    %98 = tpu.transpose %97, [1, 0, 2] : vector<8x4x8xf32> -> vector<4x8x8xf32>
    %99 = vector.shape_cast %94 : vector<8x32xf32> to vector<8x4x8xf32>
    %100 = tpu.transpose %99, [1, 0, 2] : vector<8x4x8xf32> -> vector<4x8x8xf32>
    "tpu.trace_start"() <{level = 10 : i32, message = "hnp,hmp->hnm"}> : () -> ()
    %cst_33 = arith.constant dense<0.000000e+00> : vector<4x8x8xf32>
    %101 = tpu.matmul %96, %98, %cst_33 {dimension_numbers = #tpu.dot_dimension_numbers<[2], [2], [1], [1], [0, 0, 0, 1, 1, 1], [0], [0]>} : vector<4x8x8xf32>, vector<4x8x8xf32>, vector<4x8x8xf32> -> vector<4x8x8xf32>
    "tpu.trace_stop"() : () -> ()
    %cst_34 = arith.constant 0.353553385 : f32
    %102 = vector.broadcast %cst_34 : f32 to vector<4x8x8xf32>
    %103 = arith.mulf %101, %102 : vector<4x8x8xf32>
    %cst_35 = arith.constant dense<0xFF800000> : vector<4x8xf32>
    %104 = vector.multi_reduction <maximumf>, %103, %cst_35 [2] : vector<4x8x8xf32> to vector<4x8xf32>
    %105 = vector.shape_cast %104 : vector<4x8xf32> to vector<4x8x1xf32>
    %106 = vector.broadcast %105 : vector<4x8x1xf32> to vector<4x8x8xf32>
    %107 = arith.subf %103, %106 : vector<4x8x8xf32>
    %108 = math.exp %107 : vector<4x8x8xf32>
    %cst_36 = arith.constant dense<0.000000e+00> : vector<4x8xf32>
    %109 = vector.multi_reduction <add>, %108, %cst_36 [2] : vector<4x8x8xf32> to vector<4x8xf32>
    %110 = vector.shape_cast %109 : vector<4x8xf32> to vector<4x8x1xf32>
    %111 = vector.broadcast %110 : vector<4x8x1xf32> to vector<4x8x8xf32>
    %112 = arith.divf %108, %111 : vector<4x8x8xf32>
    "tpu.trace_start"() <{level = 10 : i32, message = "hnm,hmp->hnp"}> : () -> ()
    %cst_37 = arith.constant dense<0.000000e+00> : vector<4x8x8xf32>
    %113 = tpu.matmul %112, %100, %cst_37 {dimension_numbers = #tpu.dot_dimension_numbers<[2], [1], [1], [2], [0, 0, 0, 1, 1, 2], [0], [0]>} : vector<4x8x8xf32>, vector<4x8x8xf32>, vector<4x8x8xf32> -> vector<4x8x8xf32>
    "tpu.trace_stop"() : () -> ()
    %114 = tpu.transpose %113, [1, 0, 2] : vector<4x8x8xf32> -> vector<8x4x8xf32>
    %115 = vector.shape_cast %114 : vector<8x4x8xf32> to vector<8x32xf32>
    %c152 = arith.constant 152 : index
    %c0_38 = arith.constant 0 : index
    %116 = vector.load %arg2[%c152, %c0_38] : memref<616x128xf32, #tpu.memory_space<vmem>>, vector<32x32xf32>
    %cst_39 = arith.constant dense<0.000000e+00> : vector<8x32xf32>
    %117 = tpu.matmul %115, %116, %cst_39 {dimension_numbers = #tpu.dot_dimension_numbers<[1], [0], [0], [1], [0, 0, 1, 1], [], []>} : vector<8x32xf32>, vector<32x32xf32>, vector<8x32xf32> -> vector<8x32xf32>
    %c184 = arith.constant 184 : index
    %c0_40 = arith.constant 0 : index
    %118 = vector.load %arg2[%c184, %c0_40] : memref<616x128xf32, #tpu.memory_space<vmem>>, vector<1x32xf32>
    %119 = vector.broadcast %118 : vector<1x32xf32> to vector<8x32xf32>
    %120 = arith.addf %117, %119 : vector<8x32xf32>
    %121 = arith.addf %86, %120 : vector<8x32xf32>
    %c192 = arith.constant 192 : index
    %c0_41 = arith.constant 0 : index
    %122 = vector.load %arg2[%c192, %c0_41] : memref<616x128xf32, #tpu.memory_space<vmem>>, vector<1x32xf32>
    %c200 = arith.constant 200 : index
    %c0_42 = arith.constant 0 : index
    %123 = vector.load %arg2[%c200, %c0_42] : memref<616x128xf32, #tpu.memory_space<vmem>>, vector<1x32xf32>
    %cst_43 = arith.constant dense<0.000000e+00> : vector<8xf32>
    %124 = vector.multi_reduction <add>, %121, %cst_43 [1] : vector<8x32xf32> to vector<8xf32>
    %125 = vector.shape_cast %124 : vector<8xf32> to vector<8x1xf32>
    %cst_44 = arith.constant 3.200000e+01 : f32
    %126 = vector.broadcast %cst_44 : f32 to vector<8x1xf32>
    %127 = arith.divf %125, %126 : vector<8x1xf32>
    %128 = vector.broadcast %127 : vector<8x1xf32> to vector<8x32xf32>
    %129 = arith.subf %121, %128 : vector<8x32xf32>
    %130 = arith.mulf %129, %129 : vector<8x32xf32>
    %cst_45 = arith.constant dense<0.000000e+00> : vector<8xf32>
    %131 = vector.multi_reduction <add>, %130, %cst_45 [1] : vector<8x32xf32> to vector<8xf32>
    %132 = vector.shape_cast %131 : vector<8xf32> to vector<8x1xf32>
    %cst_46 = arith.constant 3.200000e+01 : f32
    %133 = vector.broadcast %cst_46 : f32 to vector<8x1xf32>
    %134 = arith.divf %132, %133 : vector<8x1xf32>
    %135 = vector.broadcast %127 : vector<8x1xf32> to vector<8x32xf32>
    %136 = arith.subf %121, %135 : vector<8x32xf32>
    %cst_47 = arith.constant 9.99999974E-6 : f32
    %137 = vector.broadcast %cst_47 : f32 to vector<8x1xf32>
    %138 = arith.addf %134, %137 : vector<8x1xf32>
    %139 = math.rsqrt %138 : vector<8x1xf32>
    %140 = vector.broadcast %139 : vector<8x1xf32> to vector<8x32xf32>
    %141 = arith.mulf %136, %140 : vector<8x32xf32>
    %142 = vector.broadcast %122 : vector<1x32xf32> to vector<8x32xf32>
    %143 = arith.mulf %141, %142 : vector<8x32xf32>
    %144 = vector.broadcast %123 : vector<1x32xf32> to vector<8x32xf32>
    %145 = arith.addf %143, %144 : vector<8x32xf32>
    %c208 = arith.constant 208 : index
    %c0_48 = arith.constant 0 : index
    %146 = vector.load %arg2[%c208, %c0_48] : memref<616x128xf32, #tpu.memory_space<vmem>>, vector<32x32xf32>
    %cst_49 = arith.constant dense<0.000000e+00> : vector<8x32xf32>
    %147 = tpu.matmul %145, %146, %cst_49 {dimension_numbers = #tpu.dot_dimension_numbers<[1], [0], [0], [1], [0, 0, 1, 1], [], []>} : vector<8x32xf32>, vector<32x32xf32>, vector<8x32xf32> -> vector<8x32xf32>
    %c240 = arith.constant 240 : index
    %c0_50 = arith.constant 0 : index
    %148 = vector.load %arg2[%c240, %c0_50] : memref<616x128xf32, #tpu.memory_space<vmem>>, vector<1x32xf32>
    %149 = vector.broadcast %148 : vector<1x32xf32> to vector<8x32xf32>
    %150 = arith.addf %147, %149 : vector<8x32xf32>
    %cst_51 = arith.constant 0.000000e+00 : f32
    %151 = vector.broadcast %cst_51 : f32 to vector<8x32xf32>
    %152 = arith.maximumf %150, %151 : vector<8x32xf32>
    %c248 = arith.constant 248 : index
    %c0_52 = arith.constant 0 : index
    %153 = vector.load %arg2[%c248, %c0_52] : memref<616x128xf32, #tpu.memory_space<vmem>>, vector<32x32xf32>
    %cst_53 = arith.constant dense<0.000000e+00> : vector<8x32xf32>
    %154 = tpu.matmul %152, %153, %cst_53 {dimension_numbers = #tpu.dot_dimension_numbers<[1], [0], [0], [1], [0, 0, 1, 1], [], []>} : vector<8x32xf32>, vector<32x32xf32>, vector<8x32xf32> -> vector<8x32xf32>
    %c280 = arith.constant 280 : index
    %c0_54 = arith.constant 0 : index
    %155 = vector.load %arg2[%c280, %c0_54] : memref<616x128xf32, #tpu.memory_space<vmem>>, vector<1x32xf32>
    %156 = vector.broadcast %155 : vector<1x32xf32> to vector<8x32xf32>
    %157 = arith.addf %154, %156 : vector<8x32xf32>
    %cst_55 = arith.constant 0.000000e+00 : f32
    %158 = vector.broadcast %cst_55 : f32 to vector<8x32xf32>
    %159 = arith.maximumf %157, %158 : vector<8x32xf32>
    %c288 = arith.constant 288 : index
    %c0_56 = arith.constant 0 : index
    %160 = vector.load %arg2[%c288, %c0_56] : memref<616x128xf32, #tpu.memory_space<vmem>>, vector<32x32xf32>
    %cst_57 = arith.constant dense<0.000000e+00> : vector<8x32xf32>
    %161 = tpu.matmul %159, %160, %cst_57 {dimension_numbers = #tpu.dot_dimension_numbers<[1], [0], [0], [1], [0, 0, 1, 1], [], []>} : vector<8x32xf32>, vector<32x32xf32>, vector<8x32xf32> -> vector<8x32xf32>
    %c320 = arith.constant 320 : index
    %c0_58 = arith.constant 0 : index
    %162 = vector.load %arg2[%c320, %c0_58] : memref<616x128xf32, #tpu.memory_space<vmem>>, vector<1x32xf32>
    %163 = vector.broadcast %162 : vector<1x32xf32> to vector<8x32xf32>
    %164 = arith.addf %161, %163 : vector<8x32xf32>
    %cst_59 = arith.constant 0.000000e+00 : f32
    %165 = vector.broadcast %cst_59 : f32 to vector<8x32xf32>
    %166 = arith.maximumf %164, %165 : vector<8x32xf32>
    %167 = arith.addf %145, %166 : vector<8x32xf32>
    %c328 = arith.constant 328 : index
    %c0_60 = arith.constant 0 : index
    %168 = vector.load %arg2[%c328, %c0_60] : memref<616x128xf32, #tpu.memory_space<vmem>>, vector<1x32xf32>
    %c336 = arith.constant 336 : index
    %c0_61 = arith.constant 0 : index
    %169 = vector.load %arg2[%c336, %c0_61] : memref<616x128xf32, #tpu.memory_space<vmem>>, vector<1x32xf32>
    %cst_62 = arith.constant dense<0.000000e+00> : vector<8xf32>
    %170 = vector.multi_reduction <add>, %167, %cst_62 [1] : vector<8x32xf32> to vector<8xf32>
    %171 = vector.shape_cast %170 : vector<8xf32> to vector<8x1xf32>
    %cst_63 = arith.constant 3.200000e+01 : f32
    %172 = vector.broadcast %cst_63 : f32 to vector<8x1xf32>
    %173 = arith.divf %171, %172 : vector<8x1xf32>
    %174 = vector.broadcast %173 : vector<8x1xf32> to vector<8x32xf32>
    %175 = arith.subf %167, %174 : vector<8x32xf32>
    %176 = arith.mulf %175, %175 : vector<8x32xf32>
    %cst_64 = arith.constant dense<0.000000e+00> : vector<8xf32>
    %177 = vector.multi_reduction <add>, %176, %cst_64 [1] : vector<8x32xf32> to vector<8xf32>
    %178 = vector.shape_cast %177 : vector<8xf32> to vector<8x1xf32>
    %cst_65 = arith.constant 3.200000e+01 : f32
    %179 = vector.broadcast %cst_65 : f32 to vector<8x1xf32>
    %180 = arith.divf %178, %179 : vector<8x1xf32>
    %181 = vector.broadcast %173 : vector<8x1xf32> to vector<8x32xf32>
    %182 = arith.subf %167, %181 : vector<8x32xf32>
    %cst_66 = arith.constant 9.99999974E-6 : f32
    %183 = vector.broadcast %cst_66 : f32 to vector<8x1xf32>
    %184 = arith.addf %180, %183 : vector<8x1xf32>
    %185 = math.rsqrt %184 : vector<8x1xf32>
    %186 = vector.broadcast %185 : vector<8x1xf32> to vector<8x32xf32>
    %187 = arith.mulf %182, %186 : vector<8x32xf32>
    %188 = vector.broadcast %168 : vector<1x32xf32> to vector<8x32xf32>
    %189 = arith.mulf %187, %188 : vector<8x32xf32>
    %190 = vector.broadcast %169 : vector<1x32xf32> to vector<8x32xf32>
    %191 = arith.addf %189, %190 : vector<8x32xf32>
    %c344 = arith.constant 344 : index
    %c0_67 = arith.constant 0 : index
    %192 = vector.load %arg2[%c344, %c0_67] : memref<616x128xf32, #tpu.memory_space<vmem>>, vector<32x96xf32>
    %cst_68 = arith.constant dense<0.000000e+00> : vector<8x96xf32>
    %193 = tpu.matmul %191, %192, %cst_68 {dimension_numbers = #tpu.dot_dimension_numbers<[1], [0], [0], [1], [0, 0, 1, 1], [], []>} : vector<8x32xf32>, vector<32x96xf32>, vector<8x96xf32> -> vector<8x96xf32>
    %c376 = arith.constant 376 : index
    %c0_69 = arith.constant 0 : index
    %194 = vector.load %arg2[%c376, %c0_69] : memref<616x128xf32, #tpu.memory_space<vmem>>, vector<1x96xf32>
    %195 = vector.broadcast %194 : vector<1x96xf32> to vector<8x96xf32>
    %196 = arith.addf %193, %195 : vector<8x96xf32>
    %197 = vector.extract_strided_slice %196 {offsets = [0, 0], sizes = [8, 32], strides = [1, 1]} : vector<8x96xf32> to vector<8x32xf32>
    %198 = vector.extract_strided_slice %196 {offsets = [0, 32], sizes = [8, 32], strides = [1, 1]} : vector<8x96xf32> to vector<8x32xf32>
    %199 = vector.extract_strided_slice %196 {offsets = [0, 64], sizes = [8, 32], strides = [1, 1]} : vector<8x96xf32> to vector<8x32xf32>
    %200 = vector.shape_cast %197 : vector<8x32xf32> to vector<8x4x8xf32>
    %201 = tpu.transpose %200, [1, 0, 2] : vector<8x4x8xf32> -> vector<4x8x8xf32>
    %202 = vector.shape_cast %198 : vector<8x32xf32> to vector<8x4x8xf32>
    %203 = tpu.transpose %202, [1, 0, 2] : vector<8x4x8xf32> -> vector<4x8x8xf32>
    %204 = vector.shape_cast %199 : vector<8x32xf32> to vector<8x4x8xf32>
    %205 = tpu.transpose %204, [1, 0, 2] : vector<8x4x8xf32> -> vector<4x8x8xf32>
    "tpu.trace_start"() <{level = 10 : i32, message = "hnp,hmp->hnm"}> : () -> ()
    %cst_70 = arith.constant dense<0.000000e+00> : vector<4x8x8xf32>
    %206 = tpu.matmul %201, %203, %cst_70 {dimension_numbers = #tpu.dot_dimension_numbers<[2], [2], [1], [1], [0, 0, 0, 1, 1, 1], [0], [0]>} : vector<4x8x8xf32>, vector<4x8x8xf32>, vector<4x8x8xf32> -> vector<4x8x8xf32>
    "tpu.trace_stop"() : () -> ()
    %cst_71 = arith.constant 0.353553385 : f32
    %207 = vector.broadcast %cst_71 : f32 to vector<4x8x8xf32>
    %208 = arith.mulf %206, %207 : vector<4x8x8xf32>
    %cst_72 = arith.constant dense<0xFF800000> : vector<4x8xf32>
    %209 = vector.multi_reduction <maximumf>, %208, %cst_72 [2] : vector<4x8x8xf32> to vector<4x8xf32>
    %210 = vector.shape_cast %209 : vector<4x8xf32> to vector<4x8x1xf32>
    %211 = vector.broadcast %210 : vector<4x8x1xf32> to vector<4x8x8xf32>
    %212 = arith.subf %208, %211 : vector<4x8x8xf32>
    %213 = math.exp %212 : vector<4x8x8xf32>
    %cst_73 = arith.constant dense<0.000000e+00> : vector<4x8xf32>
    %214 = vector.multi_reduction <add>, %213, %cst_73 [2] : vector<4x8x8xf32> to vector<4x8xf32>
    %215 = vector.shape_cast %214 : vector<4x8xf32> to vector<4x8x1xf32>
    %216 = vector.broadcast %215 : vector<4x8x1xf32> to vector<4x8x8xf32>
    %217 = arith.divf %213, %216 : vector<4x8x8xf32>
    "tpu.trace_start"() <{level = 10 : i32, message = "hnm,hmp->hnp"}> : () -> ()
    %cst_74 = arith.constant dense<0.000000e+00> : vector<4x8x8xf32>
    %218 = tpu.matmul %217, %205, %cst_74 {dimension_numbers = #tpu.dot_dimension_numbers<[2], [1], [1], [2], [0, 0, 0, 1, 1, 2], [0], [0]>} : vector<4x8x8xf32>, vector<4x8x8xf32>, vector<4x8x8xf32> -> vector<4x8x8xf32>
    "tpu.trace_stop"() : () -> ()
    %219 = tpu.transpose %218, [1, 0, 2] : vector<4x8x8xf32> -> vector<8x4x8xf32>
    %220 = vector.shape_cast %219 : vector<8x4x8xf32> to vector<8x32xf32>
    %c384 = arith.constant 384 : index
    %c0_75 = arith.constant 0 : index
    %221 = vector.load %arg2[%c384, %c0_75] : memref<616x128xf32, #tpu.memory_space<vmem>>, vector<32x32xf32>
    %cst_76 = arith.constant dense<0.000000e+00> : vector<8x32xf32>
    %222 = tpu.matmul %220, %221, %cst_76 {dimension_numbers = #tpu.dot_dimension_numbers<[1], [0], [0], [1], [0, 0, 1, 1], [], []>} : vector<8x32xf32>, vector<32x32xf32>, vector<8x32xf32> -> vector<8x32xf32>
    %c416 = arith.constant 416 : index
    %c0_77 = arith.constant 0 : index
    %223 = vector.load %arg2[%c416, %c0_77] : memref<616x128xf32, #tpu.memory_space<vmem>>, vector<1x32xf32>
    %224 = vector.broadcast %223 : vector<1x32xf32> to vector<8x32xf32>
    %225 = arith.addf %222, %224 : vector<8x32xf32>
    %226 = arith.addf %191, %225 : vector<8x32xf32>
    %c424 = arith.constant 424 : index
    %c0_78 = arith.constant 0 : index
    %227 = vector.load %arg2[%c424, %c0_78] : memref<616x128xf32, #tpu.memory_space<vmem>>, vector<1x32xf32>
    %c432 = arith.constant 432 : index
    %c0_79 = arith.constant 0 : index
    %228 = vector.load %arg2[%c432, %c0_79] : memref<616x128xf32, #tpu.memory_space<vmem>>, vector<1x32xf32>
    %cst_80 = arith.constant dense<0.000000e+00> : vector<8xf32>
    %229 = vector.multi_reduction <add>, %226, %cst_80 [1] : vector<8x32xf32> to vector<8xf32>
    %230 = vector.shape_cast %229 : vector<8xf32> to vector<8x1xf32>
    %cst_81 = arith.constant 3.200000e+01 : f32
    %231 = vector.broadcast %cst_81 : f32 to vector<8x1xf32>
    %232 = arith.divf %230, %231 : vector<8x1xf32>
    %233 = vector.broadcast %232 : vector<8x1xf32> to vector<8x32xf32>
    %234 = arith.subf %226, %233 : vector<8x32xf32>
    %235 = arith.mulf %234, %234 : vector<8x32xf32>
    %cst_82 = arith.constant dense<0.000000e+00> : vector<8xf32>
    %236 = vector.multi_reduction <add>, %235, %cst_82 [1] : vector<8x32xf32> to vector<8xf32>
    %237 = vector.shape_cast %236 : vector<8xf32> to vector<8x1xf32>
    %cst_83 = arith.constant 3.200000e+01 : f32
    %238 = vector.broadcast %cst_83 : f32 to vector<8x1xf32>
    %239 = arith.divf %237, %238 : vector<8x1xf32>
    %240 = vector.broadcast %232 : vector<8x1xf32> to vector<8x32xf32>
    %241 = arith.subf %226, %240 : vector<8x32xf32>
    %cst_84 = arith.constant 9.99999974E-6 : f32
    %242 = vector.broadcast %cst_84 : f32 to vector<8x1xf32>
    %243 = arith.addf %239, %242 : vector<8x1xf32>
    %244 = math.rsqrt %243 : vector<8x1xf32>
    %245 = vector.broadcast %244 : vector<8x1xf32> to vector<8x32xf32>
    %246 = arith.mulf %241, %245 : vector<8x32xf32>
    %247 = vector.broadcast %227 : vector<1x32xf32> to vector<8x32xf32>
    %248 = arith.mulf %246, %247 : vector<8x32xf32>
    %249 = vector.broadcast %228 : vector<1x32xf32> to vector<8x32xf32>
    %250 = arith.addf %248, %249 : vector<8x32xf32>
    %c440 = arith.constant 440 : index
    %c0_85 = arith.constant 0 : index
    %251 = vector.load %arg2[%c440, %c0_85] : memref<616x128xf32, #tpu.memory_space<vmem>>, vector<32x32xf32>
    %cst_86 = arith.constant dense<0.000000e+00> : vector<8x32xf32>
    %252 = tpu.matmul %250, %251, %cst_86 {dimension_numbers = #tpu.dot_dimension_numbers<[1], [0], [0], [1], [0, 0, 1, 1], [], []>} : vector<8x32xf32>, vector<32x32xf32>, vector<8x32xf32> -> vector<8x32xf32>
    %c472 = arith.constant 472 : index
    %c0_87 = arith.constant 0 : index
    %253 = vector.load %arg2[%c472, %c0_87] : memref<616x128xf32, #tpu.memory_space<vmem>>, vector<1x32xf32>
    %254 = vector.broadcast %253 : vector<1x32xf32> to vector<8x32xf32>
    %255 = arith.addf %252, %254 : vector<8x32xf32>
    %cst_88 = arith.constant 0.000000e+00 : f32
    %256 = vector.broadcast %cst_88 : f32 to vector<8x32xf32>
    %257 = arith.maximumf %255, %256 : vector<8x32xf32>
    %c480 = arith.constant 480 : index
    %c0_89 = arith.constant 0 : index
    %258 = vector.load %arg2[%c480, %c0_89] : memref<616x128xf32, #tpu.memory_space<vmem>>, vector<32x32xf32>
    %cst_90 = arith.constant dense<0.000000e+00> : vector<8x32xf32>
    %259 = tpu.matmul %257, %258, %cst_90 {dimension_numbers = #tpu.dot_dimension_numbers<[1], [0], [0], [1], [0, 0, 1, 1], [], []>} : vector<8x32xf32>, vector<32x32xf32>, vector<8x32xf32> -> vector<8x32xf32>
    %c512 = arith.constant 512 : index
    %c0_91 = arith.constant 0 : index
    %260 = vector.load %arg2[%c512, %c0_91] : memref<616x128xf32, #tpu.memory_space<vmem>>, vector<1x32xf32>
    %261 = vector.broadcast %260 : vector<1x32xf32> to vector<8x32xf32>
    %262 = arith.addf %259, %261 : vector<8x32xf32>
    %cst_92 = arith.constant 0.000000e+00 : f32
    %263 = vector.broadcast %cst_92 : f32 to vector<8x32xf32>
    %264 = arith.maximumf %262, %263 : vector<8x32xf32>
    %c520 = arith.constant 520 : index
    %c0_93 = arith.constant 0 : index
    %265 = vector.load %arg2[%c520, %c0_93] : memref<616x128xf32, #tpu.memory_space<vmem>>, vector<32x32xf32>
    %cst_94 = arith.constant dense<0.000000e+00> : vector<8x32xf32>
    %266 = tpu.matmul %264, %265, %cst_94 {dimension_numbers = #tpu.dot_dimension_numbers<[1], [0], [0], [1], [0, 0, 1, 1], [], []>} : vector<8x32xf32>, vector<32x32xf32>, vector<8x32xf32> -> vector<8x32xf32>
    %c552 = arith.constant 552 : index
    %c0_95 = arith.constant 0 : index
    %267 = vector.load %arg2[%c552, %c0_95] : memref<616x128xf32, #tpu.memory_space<vmem>>, vector<1x32xf32>
    %268 = vector.broadcast %267 : vector<1x32xf32> to vector<8x32xf32>
    %269 = arith.addf %266, %268 : vector<8x32xf32>
    %cst_96 = arith.constant 0.000000e+00 : f32
    %270 = vector.broadcast %cst_96 : f32 to vector<8x32xf32>
    %271 = arith.maximumf %269, %270 : vector<8x32xf32>
    %272 = arith.addf %250, %271 : vector<8x32xf32>
    %c560 = arith.constant 560 : index
    %c0_97 = arith.constant 0 : index
    %273 = vector.load %arg2[%c560, %c0_97] : memref<616x128xf32, #tpu.memory_space<vmem>>, vector<1x32xf32>
    %c568 = arith.constant 568 : index
    %c0_98 = arith.constant 0 : index
    %274 = vector.load %arg2[%c568, %c0_98] : memref<616x128xf32, #tpu.memory_space<vmem>>, vector<1x32xf32>
    %cst_99 = arith.constant dense<0.000000e+00> : vector<8xf32>
    %275 = vector.multi_reduction <add>, %272, %cst_99 [1] : vector<8x32xf32> to vector<8xf32>
    %276 = vector.shape_cast %275 : vector<8xf32> to vector<8x1xf32>
    %cst_100 = arith.constant 3.200000e+01 : f32
    %277 = vector.broadcast %cst_100 : f32 to vector<8x1xf32>
    %278 = arith.divf %276, %277 : vector<8x1xf32>
    %279 = vector.broadcast %278 : vector<8x1xf32> to vector<8x32xf32>
    %280 = arith.subf %272, %279 : vector<8x32xf32>
    %281 = arith.mulf %280, %280 : vector<8x32xf32>
    %cst_101 = arith.constant dense<0.000000e+00> : vector<8xf32>
    %282 = vector.multi_reduction <add>, %281, %cst_101 [1] : vector<8x32xf32> to vector<8xf32>
    %283 = vector.shape_cast %282 : vector<8xf32> to vector<8x1xf32>
    %cst_102 = arith.constant 3.200000e+01 : f32
    %284 = vector.broadcast %cst_102 : f32 to vector<8x1xf32>
    %285 = arith.divf %283, %284 : vector<8x1xf32>
    %286 = vector.broadcast %278 : vector<8x1xf32> to vector<8x32xf32>
    %287 = arith.subf %272, %286 : vector<8x32xf32>
    %cst_103 = arith.constant 9.99999974E-6 : f32
    %288 = vector.broadcast %cst_103 : f32 to vector<8x1xf32>
    %289 = arith.addf %285, %288 : vector<8x1xf32>
    %290 = math.rsqrt %289 : vector<8x1xf32>
    %291 = vector.broadcast %290 : vector<8x1xf32> to vector<8x32xf32>
    %292 = arith.mulf %287, %291 : vector<8x32xf32>
    %293 = vector.broadcast %273 : vector<1x32xf32> to vector<8x32xf32>
    %294 = arith.mulf %292, %293 : vector<8x32xf32>
    %295 = vector.broadcast %274 : vector<1x32xf32> to vector<8x32xf32>
    %296 = arith.addf %294, %295 : vector<8x32xf32>
    %c576 = arith.constant 576 : index
    %c0_104 = arith.constant 0 : index
    %297 = vector.load %arg2[%c576, %c0_104] : memref<616x128xf32, #tpu.memory_space<vmem>>, vector<32x5xf32>
    %cst_105 = arith.constant dense<0.000000e+00> : vector<8x5xf32>
    %298 = tpu.matmul %296, %297, %cst_105 {dimension_numbers = #tpu.dot_dimension_numbers<[1], [0], [0], [1], [0, 0, 1, 1], [], []>} : vector<8x32xf32>, vector<32x5xf32>, vector<8x5xf32> -> vector<8x5xf32>
    %c608 = arith.constant 608 : index
    %c0_106 = arith.constant 0 : index
    %299 = vector.load %arg2[%c608, %c0_106] : memref<616x128xf32, #tpu.memory_space<vmem>>, vector<1x5xf32>
    %300 = vector.broadcast %299 : vector<1x5xf32> to vector<8x5xf32>
    %301 = arith.addf %298, %300 : vector<8x5xf32>
    %cst_107 = arith.constant dense<0xFF800000> : vector<8xf32>
    %302 = vector.multi_reduction <maximumf>, %301, %cst_107 [1] : vector<8x5xf32> to vector<8xf32>
    %303 = vector.shape_cast %302 : vector<8xf32> to vector<8x1xf32>
    %304 = vector.broadcast %303 : vector<8x1xf32> to vector<8x5xf32>
    %305 = arith.subf %301, %304 : vector<8x5xf32>
    %306 = math.exp %305 : vector<8x5xf32>
    %cst_108 = arith.constant dense<0.000000e+00> : vector<8xf32>
    %307 = vector.multi_reduction <add>, %306, %cst_108 [1] : vector<8x5xf32> to vector<8xf32>
    %308 = vector.shape_cast %307 : vector<8xf32> to vector<8x1xf32>
    %309 = math.log %308 : vector<8x1xf32>
    %310 = arith.addf %309, %303 : vector<8x1xf32>
    %311 = tpu.iota {dimensions = array<i32: 1>} : vector<8x5xi32>
    %312 = vector.broadcast %303 : vector<8x1xf32> to vector<8x5xf32>
    %313 = arith.cmpf oeq, %301, %312 : vector<8x5xf32>
    %c5_i32 = arith.constant 5 : i32
    %314 = vector.broadcast %c5_i32 : i32 to vector<8x5xi32>
    %315 = arith.select %313, %311, %314 : vector<8x5xi1>, vector<8x5xi32>
    %cst_109 = arith.constant dense<2147483647> : vector<8xi32>
    %316 = vector.multi_reduction <minsi>, %315, %cst_109 [1] : vector<8x5xi32> to vector<8xi32>
    %317 = vector.shape_cast %316 : vector<8xi32> to vector<8x1xi32>
    %318 = arith.subf %303, %310 : vector<8x1xf32>
    %c0_110 = arith.constant 0 : index
    %c0_111 = arith.constant 0 : index
    %319 = vector.load %arg3[%c0_110, %c0_111] : memref<8x128xf32, #tpu.memory_space<vmem>>, vector<8x32xf32>
    tpu.vector_store %arg3[%c0_110, %c0_111], %191 {strides = array<i32>} : memref<8x128xf32, #tpu.memory_space<vmem>>, vector<8x32xf32>,
    %320 = arith.sitofp %317 : vector<8x1xi32> to vector<8x1xf32>
    %c0_112 = arith.constant 0 : index
    %c32_113 = arith.constant 32 : index
    %321 = vector.load %arg3[%c0_112, %c32_113] : memref<8x128xf32, #tpu.memory_space<vmem>>, vector<8x1xf32>
    tpu.vector_store %arg3[%c0_112, %c32_113], %320 {strides = array<i32>} : memref<8x128xf32, #tpu.memory_space<vmem>>, vector<8x1xf32>,
    %c0_114 = arith.constant 0 : index
    %c33 = arith.constant 33 : index
    %322 = vector.load %arg3[%c0_114, %c33] : memref<8x128xf32, #tpu.memory_space<vmem>>, vector<8x1xf32>
    tpu.vector_store %arg3[%c0_114, %c33], %318 {strides = array<i32>} : memref<8x128xf32, #tpu.memory_space<vmem>>, vector<8x1xf32>,
    %cst_115 = arith.constant 0.000000e+00 : f32
    %323 = vector.broadcast %cst_115 : f32 to vector<8x94xf32>
    %c0_116 = arith.constant 0 : index
    %c34 = arith.constant 34 : index
    %324 = vector.load %arg3[%c0_116, %c34] : memref<8x128xf32, #tpu.memory_space<vmem>>, vector<8x94xf32>
    tpu.vector_store %arg3[%c0_116, %c34], %323 {strides = array<i32>} : memref<8x128xf32, #tpu.memory_space<vmem>>, vector<8x94xf32>,
    return
  }
  func.func @transform_0(%arg0: i32) -> (i32, i32) {
    %c0_i32 = arith.constant 0 : i32
    %c0_i32_0 = arith.constant 0 : i32
    return %arg0, %c0_i32 : i32, i32
  }
  func.func @transform_1(%arg0: i32) -> (i32, i32) {
    %c0_i32 = arith.constant 0 : i32
    %c0_i32_0 = arith.constant 0 : i32
    %c0_i32_1 = arith.constant 0 : i32
    return %c0_i32, %c0_i32_0 : i32, i32
  }
  func.func @transform_2(%arg0: i32) -> (i32, i32) {
    %c0_i32 = arith.constant 0 : i32
    %c0_i32_0 = arith.constant 0 : i32
    return %arg0, %c0_i32 : i32, i32
  }
}

</mosaic_0001>

<bundles_post_ra>
// kernel: tpu_custom_call.1
= control target key start
LH: loop header
LB: loop body
LE: loop exit
PB: predicated region body
PF: predicated region fallthrough
CT: control target
= control target key end

     0   :  { %7 = vsyncpa [#allocation3], 0  ;;  %s5446_s0 = inlined_call_operand.hbm [shape: f32[16,16], index: 0, kind: input, shape index: {}]   ;;  %s5447_s1 = inlined_call_operand.hbm [shape: f32[616,128], index: 1, kind: input, shape index: {}]   ;;  %s5448_s2 = inlined_call_operand.hbm [shape: f32[16,128], index: 2, kind: output, shape index: {}]  }
   0x1   :  { %9 = vsyncpa [#allocation3 + $0x1], 0 }
   0x2   :  { %10 = vsyncpa [#allocation6], 0 }
   0x3   :  { %11 = vsyncpa [#allocation4], 0 }
   0x4   :  { %13 = vsyncpa [#allocation4 + $0x1], 0  ;;  %s4809_s9 = smov 0   ;;  %s4811_s10 = smov 0  }
   0x5   :  { %s4813_s11 = smov 0   ;;  %s4815_s12 = smov 0  }
   0x6 LB: > { %s4830_s13 = sadd.s32 4294967295, %s4774_s12   ;;  %s4041_s14 = sadd.s32 4294967294, %s4774_s12   ;;  %s4774_s12 = sphi %s4815_s12, %s5468_s12   ;;  %s4770_s11 = sphi %s4813_s11, %s5467_s11   ;;  %s4766_s10 = sphi %s4811_s10, %s5466_s10   ;;  %s4762_s9 = sphi %s4809_s9, %s5465_s9  }
   0x7   : > { %p39_p0 = scmp.ne.s32.totalorder %s4766_s10, %s4762_s9  ;;  %p5449_p1 = scmp.eq.s32.totalorder %s4830_s13, 0 }
   0x8   : > { %p90_p3 = scmp.eq.s32.totalorder %s4041_s14, 1  ;;  %p4042_p5 = scmp.ge.s32.totalorder %s4774_s12, 1 }
   0x9   : > { %p4839_p4 = por %p5449_p1, %p39_p0  ;;  %p97_p7 = scmp.lt.s32.totalorder %s4774_s12, 3 }
   0xa   : > { %p4844_p6 = por %p90_p3, %p39_p0  ;;  %s4776_s18 = smov [#allocation5]  }
   0xb   : > { %s5452_s15 = scalar_select %p4839_p4, 1, 0 }
   0xc   : > { %s5453_s16 = scalar_select %p4844_p6, 1, 0 }
   0xd   : > { %p4849_p8 = pnand %p4042_p5, %p97_p7  ;;  %s109_s19 = sshll.u32 %s4776_s18, 4  ;;  %s4853_s19 = int_to_ptr.vmem [resolvable:$true] %s109_s19 }
   0xe   : > { %s4865_s21 = sadd.s32 1, %s4774_s12   ;;  %s26_s22 = sadd.s32 1, %s4770_s11 }
   0xf   : > { %s5454_s17 = scalar_select %p4849_p8, 1, 0 }
  0x10   : > { %p4532_p9 = pneg %p4849_p8  ;;  %s23_s23 = ssub.s32 %s4774_s12, %s4865_s21 }
  0x11   : > { %s4646_s26 = scalar_lea.hbm %s5447_s1, 9856 }
  0x12   : > { %p4860_p11 = pnand %p4532_p9, %p5449_p1  ;;  %p4647_p12 = scmp.ne.s32.totalorder %s5447_s1, %s4646_s26 }
  0x13   : > { %p4653_p5 = scmp.lt.u32.totalorder %s4646_s26, %s5447_s1 }
  0x14   : > { %p4648_p13 = pneg %p4860_p11 }
  0x16   : > { %p4649_p0 = pnand %p4648_p13, %p4647_p12 }
  0x18   : > { %p4650_p3 = pneg %p4649_p0 }
  0x1a   : > { %p4655_p7 = pnand %p4653_p5, %p4650_p3 }
  0x1c   : > { %4658 = shalt.err (!%p4655_p7)
}
  0x1d   : > { %s4659_s3 = scalar_lea.vmem %s4853_s19, 9856  ;;  %p4667_p2 = scmp.lt.s32.totalorder %s4853_s19, %s4853_s19 }
  0x1e   : > { %p4660_p9 = scmp.ne.s32.totalorder %s4853_s19, %s4659_s3  ;;  %p4668_p6 = scmp.lt.s32.totalorder %s4659_s3, %s4659_s3 }
  0x20   : > { %p4662_p10 = pnand %p4660_p9, %p4648_p13  ;;  %p4669_p4 = por %p4668_p6, %p4667_p2 }
  0x22   : > { %p4663_p1 = pneg %p4662_p10 }
  0x24   : > { %p4670_p8 = pnand %p4669_p4, %p4663_p1 }
  0x26   : > { %4673 = shalt.err (!%p4670_p8)
}
  0x27   : > { %s4777_s4 = smov 128   ;;  %s4778_s5 = smov 8  }
  0x28   : > { %4535 = dma.hbm_to_vmem [thread:$0]  (!%p4860_p11), %s5447_s1, 9856, %s4853_s19, [#allocation6], %s4777_s4, %s4777_s4, %s4778_s5  }
  0x29   : > { %p24_p2 = scmp.eq.s32.totalorder %s23_s23, 0  ;;  %p33_p1 = scmp.ne.s32.totalorder %s4770_s11, %s4766_s10 }
  0x2a   : > { %p34_p4 = scmp.eq.s32.totalorder %s4774_s12, 0  ;;  %p4545_p6 = scmp.lt.s32.totalorder %s4774_s12, 2 }
  0x2b   : > { %s4896_s8 = scalar_select %p24_p2, %s4770_s11, %s26_s22  }
  0x2c   : > { %p35_p8 = por %p34_p4, %p33_p1  ;;  %p5456_p10 = scmp.eq.s32.totalorder %s4830_s13, 1 }
  0x2d   : > { %s123_s18 = sand.u32 1, %s4770_s11   ;;  %s4046_s24 = sshll.u32 %s4774_s12, 7 }
  0x2e   : > { %p4900_p12 = por %p5456_p10, %p33_p1  ;;  %s4045_s25 = sshll.u32 %s123_s18, 3 }
  0x2f   : > { %s4909_s27 = scalar_lea.hbm %s5446_s0, %s4046_s24  ;;  %s127_s19 = scalar_lea.vmem [#allocation2], %s4045_s25 }
  0x30   : > { %s134_s22 = sshll.u32 %s127_s19, 4  ;;  %p4911_p11 = pnand %p4545_p6, %p35_p8  ;;  %s4915_s22 = int_to_ptr.vmem [resolvable:$true] %s134_s22 }
  0x31   : > { %s124_s28 = scalar_lea.sflag [#allocation3], %s123_s18  ;;  %s4674_s29 = scalar_lea.hbm %s4909_s27, 128 }
  0x32   : > { %p4675_p13 = scmp.ne.s32.totalorder %s4909_s27, %s4674_s29  ;;  %p4676_p0 = pneg %p4911_p11 }
  0x33   : > { %s4679_s4 = scalar_lea.hbm %s5446_s0, 256  ;;  %p4680_p7 = scmp.lt.u32.totalorder %s4909_s27, %s5446_s0 }
  0x34   : > { %p4677_p3 = pnand %p4676_p0, %p4675_p13  ;;  %p4681_p9 = scmp.lt.u32.totalorder %s4679_s4, %s4674_s29 }
  0x35   : > { %p4683_p1 = scmp.lt.u32.totalorder %s4674_s29, %s4909_s27 }
  0x36   : > { %p4678_p5 = pneg %p4677_p3  ;;  %p4682_p2 = por %p4681_p9, %p4680_p7 }
  0x38   : > { %p4684_p4 = por %p4683_p1, %p4682_p2 }
  0x3a   : > { %p4685_p6 = pnand %p4684_p4, %p4678_p5 }
  0x3c   : > { %4688 = shalt.err (!%p4685_p6)
}
  0x3d   : > { %s4689_s7 = scalar_lea.vmem %s4915_s22, 128  ;;  %s4779_s18 = smov [#allocation2]  }
  0x3e   : > { %p4690_p8 = scmp.ne.s32.totalorder %s4915_s22, %s4689_s7  ;;  %s4694_s24 = sshll.u32 %s4779_s18, 4  ;;  %s4695_s24 = int_to_ptr.vmem [resolvable:$false] %s4694_s24 }
  0x3f   : > { %s4696_s25 = scalar_lea.vmem %s4695_s24, 256  ;;  %p4697_p3 = scmp.lt.s32.totalorder %s4915_s22, %s4695_s24 }
  0x40   : > { %p4692_p10 = pnand %p4690_p8, %p4676_p0  ;;  %p4698_p7 = scmp.lt.s32.totalorder %s4696_s25, %s4689_s7 }
  0x42   : > { %p4693_p13 = pneg %p4692_p10  ;;  %p4699_p9 = por %p4698_p7, %p4697_p3 }
  0x44   : > { %p4700_p2 = pnand %p4699_p9, %p4693_p13 }
  0x46   : > { %4703 = shalt.err (!%p4700_p2)
}
  0x47   : > { %4539 = dma.hbm_to_vmem [thread:$0]  (!%p4911_p11), %s4909_s27, 128, %s4915_s22, %s124_s28  }
  0x48   : > { %p5459_p5 = scmp.ne.s32.totalorder %s5454_s17, 0 }
  0x49   : > { %s4945_s20 = sand.u32 (!%p5459_p5), 1, %s4766_s10   ;;  %p5460_p0 = scmp.ne.s32.totalorder (!%p5459_p5), %s5452_s15, 0 }
  0x4a   : > { %143 = sbr.rel (%p5459_p5) target bundleno = 7851 (0x1eab), region = 28  ;;  %s4048_s26 = sshll.u32 (!%p5459_p5), %s4945_s20, 3 }
  0x4b   : > { %s146_s19 = scalar_lea.sflag (!%p5459_p5), [#allocation3], %s4945_s20  ;;  %s149_s29 = scalar_lea.vmem (!%p5459_p5), [#allocation2], %s4048_s26 }
  0x51   : > { %4749 = dma.done.wait (%p5460_p0), %s146_s19, 128  }
  0x52   : > { %4751 = vsyncadd (%p5460_p0), %s146_s19, 4294967168  ;;  %p5461_p11 = scmp.eq.s32.totalorder %s4830_s13, 0 }
  0x54   : > { %4753 = dma.done.wait (%p5461_p11), [#allocation6], 9856   ;;  %p5462_p1 = pmov %p5461_p11 }
  0x55   : > { %vm177_vm0 = vcmask 130048   ;;  %v174_v0 = vld [vmem:[%s149_s29] sm:$0xff]  ;;  %v4780_v9 = vmov 0.0|0.0   ;;  %vm4781_vm1 = vmmov 0   ;;  %v4782_v11 = vmov 0.0   ;;  %v311_v33 = vld [vmem:[#allocation5 + $0x40] sm:$0xff] }
  0x56   : > { %4755 = vsyncadd (%p5462_p1), [#allocation6], 4294957440  ;;  %v178_v1 = vsel %vm177_vm0, %v174_v0, 0.0  ;;  %v202_v7 = vld [vmem:[#allocation5 + $0x10] sm:$0xff]  ;;  %v203_v8 = vld [vmem:[#allocation5 + $0x18] sm:$0xff]  ;;  %4449 = vmatprep.subr.bf16.mxu0 %v4780_v9  ;;  %4234 = vmatprep.mubr.msk.f32.mxu0 %vm4781_vm1, %v4782_v11  ;;  %vm285_vm2 = vcmask 261120  }
  0x57   : > { %179 = vadd.xlane.f32.xlu0 %v178_v1  ;;  %v4450_v10 = vpack.c.bf16 %v203_v8, %v202_v7  ;;  %4452 = vmatprep.subr.bf16.mxu1 %v4780_v9  ;;  %v4051_v16 = vld [vmem:[#allocation5] ss:$0 sm:$0xff]  ;;  %v4052_v18 = vld [vmem:[#allocation5 + $0x8] ss:$0 sm:$0xff]  ;;  %v310_v32 = vld [vmem:[#allocation5 + $0x38] sm:$0xff]  ;;  %s4783_s15 = smov 112  }
  0x58   : > { %4245 = vmatprep.mubr.msk.f32.mxu1 %vm4781_vm1, %v4782_v11  ;;  %v4053_v21 = vld [vmem:[#allocation5 + $0x20] ss:$0 sm:$0xff]  ;;  %v312_v34 = vld [vmem:[#allocation5 + $0x48] sm:$0xff]  ;;  %v4453_v35 = vpack.c.bf16 %v311_v33, %v310_v32  ;;  %v313_v36 = vld [vmem:[#allocation5 + $0x50] sm:$0xff]  ;;  %s4784_s17 = smov 120   ;;  %s4785_s27 = smov 104  }
  0x59   : > { %4451 = vmatpush3.bf16.msra.mxu0 %v4450_v10  ;;  %v4456_v37 = vpack.c.bf16 %v313_v36, %v312_v34  ;;  %v4055_v42 = vld [vmem:[#allocation5 + $0x28] ss:$0 sm:$0xff]  ;;  %v4056_v44 = vld [vmem:[#allocation5 + $0x30] ss:$0 sm:$0xff]  ;;  %v4057_v47 = vld [vmem:[#allocation5 + $0x58] ss:$0 sm:$0xff] }
  0x5a   : > { %4458 = vmatprep.subr.bf16.mxu0 %v4780_v9  ;;  %4454 = vmatpush3.bf16.msra.mxu1 %v4453_v35  ;;  %v418_v58 = vld [vmem:[#allocation5 + $0x70] sm:$0xff]  ;;  %v419_v59 = vld [vmem:[#allocation5 + $0x78] sm:$0xff]  ;;  %v420_v61 = vld [vmem:[#allocation5 + $0x80] sm:$0xff]  ;;  %s4786_s22 = smov 96   ;;  %vm942_vm3 = vcmask 64512   ;;  %s4789_s23 = smov 64  }
  0x5b   : > { %4455 = vmatprep.subr.bf16.mxu1 %v4780_v9  ;;  %v4459_v60 = vpack.c.bf16 %v419_v59, %v418_v58  ;;  %v421_v62 = vld [vmem:[#allocation5 + $0x88] sm:$0xff]  ;;  %v4061_v10 = vld [vmem:[#allocation5 + $0x90] ss:$0 sm:$0xff]  ;;  %s4790_s28 = smov 16   ;;  %s4791_s30 = smov 8   ;;  %vm1737_vm4 = vcmask 195584  }
  0x5c   : > { %v4462_v63 = vpack.c.bf16 %v421_v62, %v420_v61  ;;  %s4792_s3 = smov 24   ;;  %s5194_s4 = scalar_lea.vmem [#allocation7], %s4048_s26  ;;  %vm3906_vm5 = vcmask 39936   ;;  %vm3941_vm8 = vcmask 269568   ;;  %vm3943_vm9 = vcmask 277768  }
  0x5d   : > { %s4132_s5 = sshll.u32 %s4830_s13, 7  ;;  %s3961_s6 = sshll.u32 %s5194_s4, 4  ;;  %vm3945_vm10 = vcmask 1047824   ;;  %s5401_s6 = int_to_ptr.vmem [resolvable:$true] %s3961_s6 }
  0x5e   : > { %4457 = vmatpush3.bf16.msra.mxu1 %v4456_v37  ;;  %s5399_s24 = scalar_lea.hbm %s5448_s2, %s4132_s5  ;;  %s3948_s13 = scalar_lea.sflag [#allocation4], %s4945_s20 }
  0x5f   : > { %4259 = vmatprep.subr.mxu1 %v4782_v11  ;;  %s4704_s25 = scalar_lea.vmem %s5401_s6, 128  ;;  %s4793_s26 = smov [#allocation7]  }
  0x60   : > { %p4705_p4 = scmp.ne.s32.totalorder %s5401_s6, %s4704_s25  ;;  %s4708_s19 = sshll.u32 %s4793_s26, 4  ;;  %s4709_s19 = int_to_ptr.vmem [resolvable:$false] %s4708_s19 }
  0x61   : > { %s4710_s29 = scalar_lea.vmem %s4709_s19, 256  ;;  %p4711_p10 = scmp.lt.s32.totalorder %s5401_s6, %s4709_s19 }
  0x62   : > { %p4706_p6 = pnand %p4705_p4, %p4900_p12  ;;  %p4712_p13 = scmp.lt.s32.totalorder %s4710_s29, %s4704_s25 }
  0x64   : > { %p4707_p8 = pneg %p4706_p6  ;;  %p4713_p3 = por %p4712_p13, %p4711_p10 }
  0x66   : > { %p4714_p7 = pnand %p4713_p3, %p4707_p8 }
  0xe4   : > { %v180_v2 = vpop.xlane.xlu0 %179 }
  0xe5   : > { %v182_v3 = vmul.f32 0.0625, %v180_v2 }
  0xe7   : > { %v183_v4 = vsub.f32 %v174_v0, %v182_v3 }
  0xe9   : > { %v184_v5 = vmul.f32 %v183_v4, %v183_v4 }
  0xeb   : > { %v185_v6 = vsel %vm177_vm0, %v184_v5, 0.0 }
  0xec   : > { %186 = vadd.xlane.f32.xlu0 %v185_v6  ;;  %v4060_v6 = vld [vmem:[#allocation5 + $0x68] ss:$0 sm:$0xff] }
 0x179   : > { %v187_v12 = vpop.xlane.xlu0 %186 }
 0x17a   : > { %v188_v13 = vmul.f32 0.0625, %v187_v12 }
 0x17c   : > { %v189_v14 = vadd.f32 1e-05, %v188_v13 }
 0x17e   : > { %4596 = vrsqrt.f32 %v189_v14 }
 0x188   : > { %v4597_v15 = vpop.eup %4596 }
 0x189   : > { %v191_v17 = vmul.f32 %v4597_v15, %v183_v4  ;;  %v4059_v4 = vld [vmem:[#allocation5 + $0x60] ss:$0 sm:$0xff] }
 0x18b   : > { %v196_v19 = vmul.f32 %v4051_v16, %v191_v17 }
 0x18d   : > { %v201_v20 = vadd.f32 %v4052_v18, %v196_v19  ;;  %v4787_v18 = vmov 1983009808  }
 0x18e   : > { %v513_v19 = vunpack.c.l.s4 %v4787_v18 }
 0x18f   : > { %4235 = vmatmul.mubr.msk.f32.vlgmr.msra.gmra.mrb[0].mxu0 %vm177_vm0, %v201_v20  ;;  %v515_v20 = vlaneseq }
 0x190   : > { %4256 = vmatprep.mubr.msk.f32.mxu0 %vm4781_vm1, %v4782_v11  ;;  %4460 = vmatpush3.bf16.msra.mxu0 %v4459_v60 }
 0x191   : > { %4461 = vmatprep.subr.bf16.mxu0 %v4780_v9 }
 0x194   : > { %4463 = vmatpush3.bf16.msra.mxu0 %v4462_v63 }
 0x195   : > { %4264 = vmatprep.subr.mxu0 %v4782_v11 }
 0x262   : > { %v278_v22 = vpop.f32.mrb[0].mxu0 }
 0x263   : > { %v279_v23 = vadd.f32 %v4053_v21, %v278_v22  ;;  %v4236_v24 = vpop.f32.mrb[1].mxu0  ;;  %v514_v21 = vunpack.c.0.s8 %v513_v19  ;;  %v516_v22 = vshrl.u32 %v515_v20, 7 }
 0x265   : > { %v282_v25 = vmax.f32 %v279_v23, 0.0  ;;  %v4788_v23 = vmov 1934713408  }
 0x266   : > { %v545_v24 = vunpack.c.l.s4 %v4788_v23 }
 0x267   : > { %v286_v26 = vsel %vm285_vm2, %v282_v25, 0.0 }
 0x268   : > { %287 = vadd.xlane.f32.xlu1 %v286_v26 }
 0x2f5   : > { %v288_v27 = vpop.xlane.xlu1 %287 }
 0x2f6   : > { %v290_v28 = vmul.f32 0.03125, %v288_v27  ;;  %v5015_v27 = vsub.s32 %v514_v21, %v516_v22 }
 0x2f8   : > { %v291_v29 = vsub.f32 %v282_v25, %v290_v28 }
 0x2fa   : > { %v292_v30 = vmul.f32 %v291_v29, %v291_v29 }
 0x2fc   : > { %v293_v31 = vsel %vm285_vm2, %v292_v30, 0.0  ;;  %v546_v30 = vunpack.c.0.s8 %v545_v24 }
 0x2fd   : > { %294 = vadd.xlane.f32.xlu1 %v293_v31 }
 0x2fe   : > { %v5025_v36 = vsub.s32 %v546_v30, %v516_v22 }
 0x38a   : > { %v295_v38 = vpop.xlane.xlu1 %294 }
 0x38b   : > { %v296_v39 = vmul.f32 0.03125, %v295_v38 }
 0x38d   : > { %v297_v40 = vadd.f32 1e-05, %v296_v39 }
 0x38f   : > { %4598 = vrsqrt.f32 %v297_v40 }
 0x399   : > { %v4599_v41 = vpop.eup %4598 }
 0x39a   : > { %v299_v43 = vmul.f32 %v4599_v41, %v291_v29 }
 0x39c   : > { %v304_v45 = vmul.f32 %v4055_v42, %v299_v43 }
 0x39e   : > { %v309_v46 = vadd.f32 %v4056_v44, %v304_v45 }
 0x3a0   : > { %4246 = vmatmul.mubr.msk.f32.vlgmr.msra.gmra.mrb[0].mxu1 %vm285_vm2, %v309_v46 }
 0x3a1   : > { %4261 = vmatprep.mubr.msk.f32.mxu1 %vm4781_vm1, %v4782_v11 }
 0x473   : > { %v388_v48 = vpop.f32.mrb[0].mxu1 }
 0x474   : > { %v389_v49 = vadd.f32 %v4057_v47, %v388_v48  ;;  %v4247_v50 = vpop.f32.mrb[1].mxu1 }
 0x476   : > { %v392_v51 = vmax.f32 %v389_v49, 0.0 }
 0x478   : > { %v395_v52 = vsel %vm285_vm2, %v392_v51, 0.0 }
 0x479   : > { %396 = vadd.xlane.f32.xlu0 %v395_v52 }
 0x506   : > { %v397_v53 = vpop.xlane.xlu0 %396 }
 0x507   : > { %v398_v54 = vmul.f32 0.03125, %v397_v53 }
 0x509   : > { %v399_v55 = vsub.f32 %v392_v51, %v398_v54 }
 0x50b   : > { %v400_v56 = vmul.f32 %v399_v55, %v399_v55 }
 0x50d   : > { %v401_v57 = vsel %vm285_vm2, %v400_v56, 0.0 }
 0x50e   : > { %402 = vadd.xlane.f32.xlu1 %v401_v57 }
 0x59b   : > { %v403_v0 = vpop.xlane.xlu1 %402 }
 0x59c   : > { %v404_v1 = vmul.f32 0.03125, %v403_v0 }
 0x59e   : > { %v405_v2 = vadd.f32 1e-05, %v404_v1 }
 0x5a0   : > { %4600 = vrsqrt.f32 %v405_v2 }
 0x5aa   : > { %v4601_v3 = vpop.eup %4600 }
 0x5ab   : > { %v407_v5 = vmul.f32 %v4601_v3, %v399_v55 }
 0x5ad   : > { %v412_v7 = vmul.f32 %v4059_v4, %v407_v5 }
 0x5af   : > { %v4982_v8 = vadd.f32 %v4060_v6, %v412_v7 }
 0x5b1   : > { %4257 = vmatmul.mubr.msk.f32.vlgmr.msra.gmra.mrb[2].mxu0 %vm285_vm2, %v4982_v8 }
 0x5b2   : > { %4266 = vmatprep.mubr.msk.f32.mxu0 %vm4781_vm1, %v4782_v11 }
 0x684   : > { %v496_v12 = vpop.f32.mrb[2].mxu0 }
 0x685   : > { %v4988_v13 = vadd.f32 %v4061_v10, %v496_v12  ;;  %v4258_v14 = vpop.f32.mrb[3].mxu0 }
 0x687   : > { %504 = vrot.lane.b32.xlu1 %v4988_v13, %s4783_s15  ;;  %501 = vrot.lane.b32.xlu0 %v4988_v13, %s4784_s17 }
 0x68b   : > { %507 = vrot.lane.b32.xlu1 %v4988_v13, %s4785_s27 }
 0x68f   : > { %646 = vrot.lane.b32.xlu1 %v4988_v13, %s4786_s22 }
 0x6f9   : > { %v4998_v15 = vpop.permute.xlu1 %504  ;;  %v5000_v16 = vpop.permute.xlu0 %501 }
 0x6fa   : > { %650 = vrot.lane.b32.xlu1 %v4998_v15, %s4786_s22  ;;  %648 = vrot.lane.b32.xlu0 %v5000_v16, %s4786_s22  ;;  %v510_v28 = vcombine.low %v4988_v13, %v4998_v15  ;;  %v511_v29 = vcombine.high %v4988_v13, %v4998_v15 }
 0x6fc   : > { %v518_v34 = vrot.slane %v510_v28, %v5015_v27  ;;  %v525_v35 = vrot.slane %v511_v29, %v5015_v27 }
 0x6fd   : > { %v5006_v17 = vpop.permute.xlu1 %507 }
 0x6fe   : > { %652 = vrot.lane.b32.xlu0 %v5006_v17, %s4786_s22  ;;  %v526_v25 = vcombine.low %v5000_v16, %v5006_v17  ;;  %v527_v26 = vcombine.high %v5000_v16, %v5006_v17 }
 0x700   : > { %v534_v31 = vrot.slane %v526_v25, %v5015_v27  ;;  %v541_v32 = vrot.slane %v527_v26, %v5015_v27 }
 0x701   : > { %v647_v33 = vpop.permute.xlu1 %646 }
 0x702   : > { %v542_v37 = vcombine.low %v518_v34, %v534_v31  ;;  %v543_v38 = vcombine.high %v518_v34, %v534_v31  ;;  %v558_v39 = vcombine.low %v525_v35, %v541_v32  ;;  %v559_v40 = vcombine.high %v525_v35, %v541_v32 }
 0x704   : > { %v550_v45 = vrot.slane %v542_v37, %v5025_v36  ;;  %v557_v46 = vrot.slane %v543_v38, %v5025_v36  ;;  %v566_v47 = vrot.slane %v558_v39, %v5025_v36  ;;  %v573_v48 = vrot.slane %v559_v40, %v5025_v36 }
 0x706   : > { %v578_v56 = vcombine.low %v550_v45, %v557_v46  ;;  %v4063_v57 = vcombine.high %v550_v45, %v557_v46  ;;  %v594_v58 = vcombine.low %v566_v47, %v573_v48  ;;  %v4064_v59 = vcombine.high %v566_v47, %v573_v48 }
 0x708   : > { %v585_v4 = vrot.slane %v578_v56, %v5015_v27  ;;  %v593_v5 = vrot.slane %v4063_v57, %v5015_v27  ;;  %v601_v6 = vrot.slane %v594_v58, %v5015_v27  ;;  %v609_v7 = vrot.slane %v4064_v59, %v5015_v27 }
 0x70a   : > { %v610_v24 = vcombine.low %v585_v4, %v593_v5  ;;  %v626_v25 = vcombine.low %v601_v6, %v609_v7  ;;  %v627_v37 = vcombine.high %v601_v6, %v609_v7 }
 0x70c   : > { %v618_v34 = vrot.slane %v610_v24, %v5025_v36  ;;  %v634_v35 = vrot.slane %v626_v25, %v5025_v36  ;;  %v641_v45 = vrot.slane %v627_v37, %v5025_v36 }
 0x76c   : > { %v651_v41 = vpop.permute.xlu1 %650  ;;  %v649_v42 = vpop.permute.xlu0 %648 }
 0x76d   : > { %v658_v43 = vcombine.low %v647_v33, %v651_v41  ;;  %v659_v44 = vcombine.high %v647_v33, %v651_v41  ;;  %v611_v33 = vcombine.high %v585_v4, %v593_v5 }
 0x76f   : > { %v666_v52 = vrot.slane %v658_v43, %v5015_v27  ;;  %v673_v53 = vrot.slane %v659_v44, %v5015_v27  ;;  %v642_v43 = vcombine.low %v618_v34, %v634_v35  ;;  %v643_v44 = vcombine.high %v618_v34, %v634_v35 }
 0x770   : > { %v653_v49 = vpop.permute.xlu0 %652 }
 0x771   : > { %v674_v50 = vcombine.low %v649_v42, %v653_v49  ;;  %v675_v51 = vcombine.high %v649_v42, %v653_v49  ;;  %v625_v42 = vrot.slane %v611_v33, %v5025_v36 }
 0x773   : > { %v682_v54 = vrot.slane %v674_v50, %v5015_v27  ;;  %v689_v55 = vrot.slane %v675_v51, %v5015_v27  ;;  %v644_v48 = vcombine.low %v625_v42, %v641_v45  ;;  %v645_v49 = vcombine.high %v625_v42, %v641_v45 }
 0x775   : > { %v690_v60 = vcombine.low %v666_v52, %v682_v54  ;;  %v691_v61 = vcombine.high %v666_v52, %v682_v54  ;;  %v706_v62 = vcombine.low %v673_v53, %v689_v55  ;;  %v707_v63 = vcombine.high %v673_v53, %v689_v55 }
 0x777   : > { %v698_v0 = vrot.slane %v690_v60, %v5025_v36  ;;  %v705_v1 = vrot.slane %v691_v61, %v5025_v36  ;;  %v714_v2 = vrot.slane %v706_v62, %v5025_v36  ;;  %v721_v3 = vrot.slane %v707_v63, %v5025_v36 }
 0x779   : > { %v726_v10 = vcombine.low %v698_v0, %v705_v1  ;;  %v4065_v12 = vcombine.high %v698_v0, %v705_v1  ;;  %v742_v14 = vcombine.low %v714_v2, %v721_v3  ;;  %v4066_v18 = vcombine.high %v714_v2, %v721_v3 }
 0x77b   : > { %v733_v19 = vrot.slane %v726_v10, %v5015_v27  ;;  %v741_v21 = vrot.slane %v4065_v12, %v5015_v27  ;;  %v749_v22 = vrot.slane %v742_v14, %v5015_v27  ;;  %v757_v23 = vrot.slane %v4066_v18, %v5015_v27 }
 0x77d   : > { %v758_v26 = vcombine.low %v733_v19, %v741_v21  ;;  %v759_v28 = vcombine.high %v733_v19, %v741_v21  ;;  %v774_v29 = vcombine.low %v749_v22, %v757_v23  ;;  %v775_v30 = vcombine.high %v749_v22, %v757_v23 }
 0x77f   : > { %v766_v31 = vrot.slane %v758_v26, %v5025_v36  ;;  %v782_v32 = vrot.slane %v774_v29, %v5025_v36  ;;  %v773_v40 = vrot.slane %v759_v28, %v5025_v36  ;;  %v789_v41 = vrot.slane %v775_v30, %v5025_v36 }
 0x781   : > { %v790_v38 = vcombine.low %v766_v31, %v782_v32  ;;  %v791_v39 = vcombine.high %v766_v31, %v782_v32  ;;  %v792_v46 = vcombine.low %v773_v40, %v789_v41  ;;  %v793_v47 = vcombine.high %v773_v40, %v789_v41 }
 0x783   : > { %4260 = vmatpush3.xpose.msk.msra.mxu1 %vm942_vm3, %v790_v38  ;;  %4265 = vmatpush3.xpose.msk.msra.mxu0 %vm942_vm3, %v791_v39 }
 0x784   : > { %4269 = vmatprep.subr.mxu1 %v4782_v11  ;;  %4274 = vmatprep.subr.mxu0 %v4782_v11 }
 0x786   : > { %4262 = vmatmul.mubr.msk.f32.vlgmr.msra.gmra.mrb[2].mxu1 %vm942_vm3, %v642_v43  ;;  %4267 = vmatmul.mubr.msk.f32.vlgmr.msra.gmra.mrb[4].mxu0 %vm942_vm3, %v643_v44 }
 0x787   : > { %4270 = vmatpush3.xpose.msk.msra.mxu1 %vm942_vm3, %v792_v46  ;;  %4275 = vmatpush3.xpose.msk.msra.mxu0 %vm942_vm3, %v793_v47 }
 0x788   : > { %4271 = vmatprep.mubr.msk.f32.mxu1 %vm4781_vm1, %v4782_v11  ;;  %4276 = vmatprep.mubr.msk.f32.mxu0 %vm4781_vm1, %v4782_v11 }
 0x789   : > { %4279 = vmatprep.subr.mxu1 %v4782_v11  ;;  %4284 = vmatprep.subr.mxu0 %v4782_v11 }
 0x78a   : > { %4272 = vmatmul.mubr.msk.f32.vlgmr.msra.gmra.mrb[4].mxu1 %vm942_vm3, %v644_v48  ;;  %4277 = vmatmul.mubr.msk.f32.vlgmr.msra.gmra.mrb[6].mxu0 %vm942_vm3, %v645_v49 }
 0x78b   : > { %4281 = vmatprep.mubr.msk.f32.mxu1 %vm4781_vm1, %v4782_v11  ;;  %4286 = vmatprep.mubr.msk.f32.mxu0 %vm4781_vm1, %v4782_v11 }
 0x859   : > { %v1015_v50 = vpop.f32.mrb[2].mxu1  ;;  %v1091_v51 = vpop.f32.mrb[4].mxu0 }
 0x85a   : > { %v1247_v52 = vmul.f32 0.35355338, %v1015_v50  ;;  %v1248_v53 = vmul.f32 0.35355338, %v1091_v51  ;;  %v4263_v54 = vpop.f32.mrb[3].mxu1  ;;  %v4268_v55 = vpop.f32.mrb[5].mxu0 }
 0x85c   : > { %v1251_v56 = vsel %vm942_vm3, %v1247_v52, -inf  ;;  %v1254_v57 = vsel %vm942_vm3, %v1248_v53, -inf }
 0x85d   : > { %1252 = vmax.xlane.f32.xlu1 %v1251_v56  ;;  %v1167_v58 = vpop.f32.mrb[4].mxu1  ;;  %1255 = vmax.xlane.f32.xlu0 %v1254_v57  ;;  %v1243_v59 = vpop.f32.mrb[6].mxu0 }
 0x85e   : > { %v1249_v60 = vmul.f32 0.35355338, %v1167_v58  ;;  %v4273_v61 = vpop.f32.mrb[5].mxu1  ;;  %v4278_v62 = vpop.f32.mrb[7].mxu0  ;;  %v1250_v63 = vmul.f32 0.35355338, %v1243_v59 }
 0x860   : > { %v1257_v0 = vsel %vm942_vm3, %v1249_v60, -inf  ;;  %v1260_v1 = vsel %vm942_vm3, %v1250_v63, -inf }
 0x861   : > { %1258 = vmax.xlane.f32.xlu0 %v1257_v0 }
 0x865   : > { %1261 = vmax.xlane.f32.xlu0 %v1260_v1 }
 0x86e   : > { %794 = vrot.lane.b32.xlu1 %v4988_v13, %s4789_s23 }
 0x8ea   : > { %v1253_v2 = vpop.xlane.xlu1 %1252  ;;  %v1256_v3 = vpop.xlane.xlu0 %1255 }
 0x8eb   : > { %v1263_v4 = vsub.f32 %v1247_v52, %v1253_v2  ;;  %v1264_v5 = vsub.f32 %v1248_v53, %v1256_v3 }
 0x8ed   : > { %v1267_v6 = vmul.f32 1.442695, %v1263_v4  ;;  %v1269_v7 = vmul.f32 1.442695, %v1264_v5 }
 0x8ee   : > { %v1259_v10 = vpop.xlane.xlu0 %1258  ;;  %v795_v30 = vpop.permute.xlu1 %794 }
 0x8ef   : > { %4602 = vpow2.f32 %v1267_v6  ;;  %v1265_v12 = vsub.f32 %v1249_v60, %v1259_v10 }
 0x8f0   : > { %4604 = vpow2.f32 %v1269_v7 }
 0x8f1   : > { %v1271_v14 = vmul.f32 1.442695, %v1265_v12 }
 0x8f2   : > { %v1262_v18 = vpop.xlane.xlu0 %1261 }
 0x8f3   : > { %4606 = vpow2.f32 %v1271_v14  ;;  %v1266_v19 = vsub.f32 %v1250_v63, %v1262_v18 }
 0x8f5   : > { %v1273_v21 = vmul.f32 1.442695, %v1266_v19 }
 0x8f7   : > { %4608 = vpow2.f32 %v1273_v21 }
 0x8f9   : > { %v5081_v22 = vpop.eup %4602 }
 0x8fa   : > { %v5083_v23 = vpop.eup %4604  ;;  %v1275_v13 = vsel %vm942_vm3, %v5081_v22, 0.0 }
 0x8fb   : > { %1276 = vadd.xlane.f32.xlu1 %v1275_v13  ;;  %v1278_v24 = vsel %vm942_vm3, %v5083_v23, 0.0 }
 0x8fc   : > { %1279 = vadd.xlane.f32.xlu0 %v1278_v24 }
 0x8fd   : > { %v5089_v25 = vpop.eup %4606 }
 0x8fe   : > { %v1281_v26 = vsel %vm942_vm3, %v5089_v25, 0.0 }
 0x8ff   : > { %1282 = vadd.xlane.f32.xlu1 %v1281_v26 }
 0x901   : > { %v5093_v28 = vpop.eup %4608 }
 0x902   : > { %v1284_v29 = vsel %vm942_vm3, %v5093_v28, 0.0 }
 0x903   : > { %1285 = vadd.xlane.f32.xlu0 %v1284_v29 }
 0x910   : > { %798 = vrot.lane.b32.xlu1 %v4998_v15, %s4789_s23 }
 0x914   : > { %800 = vrot.lane.b32.xlu1 %v5006_v17, %s4789_s23 }
 0x919   : > { %796 = vrot.lane.b32.xlu0 %v5000_v16, %s4789_s23 }
 0x988   : > { %v1277_v31 = vpop.xlane.xlu1 %1276 }
 0x989   : > { %v1280_v32 = vpop.xlane.xlu0 %1279  ;;  %4610 = vrcp.f32 %v1277_v31 }
 0x98a   : > { %4612 = vrcp.f32 %v1280_v32 }
 0x98c   : > { %v1283_v33 = vpop.xlane.xlu1 %1282 }
 0x98d   : > { %4614 = vrcp.f32 %v1283_v33 }
 0x990   : > { %v799_v34 = vpop.permute.xlu1 %798  ;;  %v1286_v35 = vpop.xlane.xlu0 %1285 }
 0x991   : > { %v806_v37 = vcombine.low %v795_v30, %v799_v34  ;;  %v807_v38 = vcombine.high %v795_v30, %v799_v34  ;;  %4616 = vrcp.f32 %v1286_v35 }
 0x993   : > { %v814_v15 = vrot.slane %v806_v37, %v5015_v27  ;;  %v821_v17 = vrot.slane %v807_v38, %v5015_v27  ;;  %v4611_v60 = vpop.eup %4610 }
 0x994   : > { %v801_v39 = vpop.permute.xlu1 %800  ;;  %v797_v40 = vpop.permute.xlu0 %796  ;;  %v1288_v14 = vmul.f32 %v4611_v60, %v5081_v22  ;;  %v1739_v22 = vld [vmem:[#allocation5 + $0x98] sm:$0xff] }
 0x995   : > { %v822_v41 = vcombine.low %v797_v40, %v801_v39  ;;  %v823_v42 = vcombine.high %v797_v40, %v801_v39  ;;  %v4613_v1 = vpop.eup %4612 }
 0x996   : > { %v1290_v18 = vmul.f32 %v4613_v1, %v5083_v23  ;;  %v1740_v23 = vld [vmem:[#allocation5 + $0xa0] sm:$0xff] }
 0x997   : > { %v830_v43 = vrot.slane %v822_v41, %v5015_v27  ;;  %v837_v16 = vrot.slane %v823_v42, %v5015_v27  ;;  %v4615_v4 = vpop.eup %4614 }
 0x998   : > { %v1292_v13 = vmul.f32 %v4615_v4, %v5089_v25  ;;  %v4465_v25 = vpack.c.bf16 %v1740_v23, %v1739_v22 }
 0x999   : > { %v838_v44 = vcombine.low %v814_v15, %v830_v43  ;;  %v839_v45 = vcombine.high %v814_v15, %v830_v43  ;;  %v854_v46 = vcombine.low %v821_v17, %v837_v16  ;;  %v855_v47 = vcombine.high %v821_v17, %v837_v16 }
 0x99b   : > { %v846_v48 = vrot.slane %v838_v44, %v5025_v36  ;;  %v853_v49 = vrot.slane %v839_v45, %v5025_v36  ;;  %v862_v50 = vrot.slane %v854_v46, %v5025_v36  ;;  %v869_v51 = vrot.slane %v855_v47, %v5025_v36  ;;  %v4617_v12 = vpop.eup %4616  ;;  %v1741_v45 = vld [vmem:[#allocation5 + $0xa8] sm:$0xff]  ;;  %v1742_v46 = vld [vmem:[#allocation5 + $0xb0] sm:$0xff] }
 0x99c   : > { %v1294_v24 = vmul.f32 %v4617_v12, %v5093_v28 }
 0x99d   : > { %v874_v52 = vcombine.low %v846_v48, %v853_v49  ;;  %v4067_v53 = vcombine.high %v846_v48, %v853_v49  ;;  %v890_v54 = vcombine.low %v862_v50, %v869_v51  ;;  %v4068_v55 = vcombine.high %v862_v50, %v869_v51 }
 0x99e   : > { %v4468_v51 = vpack.c.bf16 %v1742_v46, %v1741_v45  ;;  %v4086_v45 = vld [vmem:[#allocation5 + $0xc8] ss:$0 sm:$0xff] }
 0x99f   : > { %v881_v56 = vrot.slane %v874_v52, %v5015_v27  ;;  %v889_v57 = vrot.slane %v4067_v53, %v5015_v27  ;;  %v897_v58 = vrot.slane %v890_v54, %v5015_v27  ;;  %v905_v59 = vrot.slane %v4068_v55, %v5015_v27 }
 0x9a1   : > { %v906_v61 = vcombine.low %v881_v56, %v889_v57  ;;  %v922_v62 = vcombine.low %v897_v58, %v905_v59  ;;  %v907_v63 = vcombine.high %v881_v56, %v889_v57  ;;  %v923_v0 = vcombine.high %v897_v58, %v905_v59 }
 0x9a3   : > { %v914_v2 = vrot.slane %v906_v61, %v5025_v36  ;;  %v930_v3 = vrot.slane %v922_v62, %v5025_v36  ;;  %v921_v5 = vrot.slane %v907_v63, %v5025_v36  ;;  %v937_v6 = vrot.slane %v923_v0, %v5025_v36 }
 0x9a5   : > { %v938_v7 = vcombine.low %v914_v2, %v930_v3  ;;  %v939_v10 = vcombine.high %v914_v2, %v930_v3  ;;  %v940_v19 = vcombine.low %v921_v5, %v937_v6  ;;  %v941_v21 = vcombine.high %v921_v5, %v937_v6 }
 0x9a7   : > { %4280 = vmatpush3.msra.mxu1 %v938_v7  ;;  %4285 = vmatpush3.msra.mxu0 %v939_v10 }
 0x9a8   : > { %4282 = vmatmul.mubr.msk.f32.vlgmr.msra.gmra.mrb[6].mxu1 %vm942_vm3, %v1288_v14  ;;  %4287 = vmatmul.mubr.msk.f32.vlgmr.msra.gmra.mrb[8].mxu0 %vm942_vm3, %v1290_v18 }
 0x9a9   : > { %4289 = vmatprep.subr.mxu1 %v4782_v11  ;;  %4294 = vmatprep.subr.mxu0 %v4782_v11 }
 0x9aa   : > { %4290 = vmatpush3.msra.mxu1 %v940_v19  ;;  %4295 = vmatpush3.msra.mxu0 %v941_v21 }
 0x9ab   : > { %4291 = vmatprep.mubr.msk.f32.mxu1 %vm4781_vm1, %v4782_v11  ;;  %4296 = vmatprep.mubr.msk.f32.mxu0 %vm4781_vm1, %v4782_v11 }
 0x9ac   : > { %4292 = vmatmul.mubr.msk.f32.vlgmr.msra.gmra.mrb[8].mxu1 %vm942_vm3, %v1292_v13  ;;  %4297 = vmatmul.mubr.msk.f32.vlgmr.msra.gmra.mrb[10].mxu0 %vm942_vm3, %v1294_v24  ;;  %v4083_v13 = vld [vmem:[#allocation5 + $0xb8] ss:$0 sm:$0xff] }
 0x9ad   : > { %4464 = vmatprep.subr.bf16.mxu1 %v4780_v9  ;;  %4307 = vmatprep.mubr.msk.f32.mxu1 %vm4781_vm1, %v4782_v11 }
 0x9ae   : > { %4470 = vmatprep.subr.bf16.mxu0 %v4780_v9  ;;  %4318 = vmatprep.mubr.msk.f32.mxu0 %vm4781_vm1, %v4782_v11 }
 0x9af   : > { %4466 = vmatpush3.bf16.msra.mxu1 %v4465_v25 }
 0x9b0   : > { %4467 = vmatprep.subr.bf16.mxu1 %v4780_v9 }
 0x9b3   : > { %4469 = vmatpush3.bf16.msra.mxu1 %v4468_v51  ;;  %v2013_v51 = vld [vmem:[#allocation5 + $0x120] sm:$0xff] }
 0x9b4   : > { %4476 = vmatprep.subr.bf16.mxu1 %v4780_v9 }
 0xa7b   : > { %v1364_v26 = vpop.f32.mrb[6].mxu1  ;;  %v1437_v28 = vpop.f32.mrb[8].mxu0 }
 0xa7c   : > { %v4283_v29 = vpop.f32.mrb[7].mxu1  ;;  %v4288_v30 = vpop.f32.mrb[9].mxu0 }
 0xa7f   : > { %v1510_v31 = vpop.f32.mrb[8].mxu1  ;;  %v1583_v32 = vpop.f32.mrb[10].mxu0 }
 0xa80   : > { %v1587_v33 = vcombine.low %v1364_v26, %v1510_v31  ;;  %v1588_v34 = vcombine.high %v1364_v26, %v1510_v31  ;;  %v1603_v35 = vcombine.low %v1437_v28, %v1583_v32  ;;  %v1604_v37 = vcombine.high %v1437_v28, %v1583_v32  ;;  %v4293_v38 = vpop.f32.mrb[9].mxu1  ;;  %v4298_v39 = vpop.f32.mrb[11].mxu0 }
 0xa81   : > { %v1850_v38 = vld [vmem:[#allocation5 + $0xe8] sm:$0xff] }
 0xa82   : > { %v1595_v40 = vrot.slane %v1587_v33, %v5015_v27  ;;  %v1602_v41 = vrot.slane %v1588_v34, %v5015_v27  ;;  %v1611_v42 = vrot.slane %v1603_v35, %v5015_v27  ;;  %v1618_v15 = vrot.slane %v1604_v37, %v5015_v27  ;;  %v1847_v33 = vld [vmem:[#allocation5 + $0xd0] sm:$0xff]  ;;  %v1848_v34 = vld [vmem:[#allocation5 + $0xd8] sm:$0xff]  ;;  %v1849_v37 = vld [vmem:[#allocation5 + $0xe0] sm:$0xff] }
 0xa83   : > { %v4471_v35 = vpack.c.bf16 %v1848_v34, %v1847_v33  ;;  %v4474_v39 = vpack.c.bf16 %v1850_v38, %v1849_v37  ;;  %v4093_v33 = vld [vmem:[#allocation5 + $0x148] ss:$0 sm:$0xff] }
 0xa84   : > { %v1619_v17 = vcombine.low %v1595_v40, %v1611_v42  ;;  %v1620_v43 = vcombine.high %v1595_v40, %v1611_v42  ;;  %v1635_v16 = vcombine.low %v1602_v41, %v1618_v15  ;;  %v1636_v44 = vcombine.high %v1602_v41, %v1618_v15  ;;  %v1931_v40 = vld [vmem:[#allocation5 + $0x100] sm:$0xff] }
 0xa85   : > { %4472 = vmatpush3.bf16.msra.mxu0 %v4471_v35  ;;  %v4094_v35 = vld [vmem:[#allocation5 + $0x150] ss:$0 sm:$0xff] }
 0xa86   : > { %v1627_v47 = vrot.slane %v1619_v17, %v5025_v36  ;;  %v1634_v48 = vrot.slane %v1620_v43, %v5025_v36  ;;  %v1643_v49 = vrot.slane %v1635_v16, %v5025_v36  ;;  %v1650_v50 = vrot.slane %v1636_v44, %v5025_v36  ;;  %4473 = vmatprep.subr.bf16.mxu0 %v4780_v9  ;;  %v4085_v16 = vld [vmem:[#allocation5 + $0xc0] ss:$0 sm:$0xff] }
 0xa88   : > { %v1655_v52 = vcombine.low %v1627_v47, %v1634_v48  ;;  %v4081_v53 = vcombine.high %v1627_v47, %v1634_v48  ;;  %v1671_v54 = vcombine.low %v1643_v49, %v1650_v50  ;;  %v4082_v55 = vcombine.high %v1643_v49, %v1650_v50  ;;  %v1932_v48 = vld [vmem:[#allocation5 + $0x108] sm:$0xff]  ;;  %v1933_v49 = vld [vmem:[#allocation5 + $0x110] sm:$0xff] }
 0xa89   : > { %4475 = vmatpush3.bf16.msra.mxu0 %v4474_v39  ;;  %v4480_v50 = vpack.c.bf16 %v1933_v49, %v1932_v48  ;;  %v4095_v39 = vld [vmem:[#allocation5 + $0x178] ss:$0 sm:$0xff] }
 0xa8a   : > { %v1662_v56 = vrot.slane %v1655_v52, %v5015_v27  ;;  %v1670_v57 = vrot.slane %v4081_v53, %v5015_v27  ;;  %v1678_v58 = vrot.slane %v1671_v54, %v5015_v27  ;;  %v1686_v59 = vrot.slane %v4082_v55, %v5015_v27  ;;  %4482 = vmatprep.subr.bf16.mxu0 %v4780_v9  ;;  %v2014_v52 = vld [vmem:[#allocation5 + $0x128] sm:$0xff]  ;;  %v4087_v54 = vld [vmem:[#allocation5 + $0xf0] ss:$0 sm:$0xff] }
 0xa8b   : > { %v4483_v53 = vpack.c.bf16 %v2014_v52, %v2013_v51 }
 0xa8c   : > { %v1688_v60 = vcombine.high %v1662_v56, %v1670_v57  ;;  %v1704_v61 = vcombine.high %v1678_v58, %v1686_v59  ;;  %v1687_v62 = vcombine.low %v1662_v56, %v1670_v57  ;;  %v1703_v63 = vcombine.low %v1678_v58, %v1686_v59  ;;  %v2015_v59 = vld [vmem:[#allocation5 + $0x130] sm:$0xff] }
 0xa8e   : > { %v1702_v0 = vrot.slane %v1688_v60, %v5025_v36  ;;  %v1718_v1 = vrot.slane %v1704_v61, %v5025_v36  ;;  %v1695_v2 = vrot.slane %v1687_v62, %v5025_v36  ;;  %v1711_v3 = vrot.slane %v1703_v63, %v5025_v36  ;;  %v2016_v60 = vld [vmem:[#allocation5 + $0x138] sm:$0xff] }
 0xa8f   : > { %v4486_v61 = vpack.c.bf16 %v2016_v60, %v2015_v59  ;;  %v4089_v62 = vld [vmem:[#allocation5 + $0x118] ss:$0 sm:$0xff] }
 0xa90   : > { %v1721_v4 = vcombine.low %v1702_v0, %v1718_v1  ;;  %v1720_v5 = vcombine.high %v1695_v2, %v1711_v3  ;;  %v1722_v6 = vcombine.high %v1702_v0, %v1718_v1  ;;  %v1719_v7 = vcombine.low %v1695_v2, %v1711_v3  ;;  %v4091_v3 = vld [vmem:[#allocation5 + $0x140] ss:$0 sm:$0xff] }
 0xa92   : > { %1728 = vrot.lane.b32.xlu0 %v1721_v4, %s4790_s28  ;;  %1724 = vrot.lane.b32.xlu1 %v1720_v5, %s4791_s30 }
 0xa96   : > { %1732 = vrot.lane.b32.xlu1 %v1722_v6, %s4792_s3 }
 0xb04   : > { %v1725_v10 = vpop.permute.xlu1 %1724  ;;  %v1729_v12 = vpop.permute.xlu0 %1728 }
 0xb05   : > { %v1735_v14 = vsel %vm942_vm3, %v1719_v7, %v1725_v10 }
 0xb06   : > { %v1736_v19 = vsel %vm177_vm0, %v1735_v14, %v1729_v12 }
 0xb08   : > { %v1733_v18 = vpop.permute.xlu1 %1732 }
 0xb09   : > { %v1738_v21 = vsel %vm1737_vm4, %v1736_v19, %v1733_v18 }
 0xb0a   : > { %4308 = vmatmul.mubr.msk.f32.vlgmr.msra.gmra.mrb[10].mxu1 %vm285_vm2, %v1738_v21 }
 0xb0b   : > { %4329 = vmatprep.mubr.msk.f32.mxu1 %vm4781_vm1, %v4782_v11 }
 0xbdd   : > { %v1817_v24 = vpop.f32.mrb[10].mxu1 }
 0xbde   : > { %v1818_v22 = vadd.f32 %v4083_v13, %v1817_v24  ;;  %v4309_v23 = vpop.f32.mrb[11].mxu1  ;;  %v2122_v24 = vld [vmem:[#allocation5 + $0x158] sm:$0xff] }
 0xbe0   : > { %v1821_v25 = vadd.f32 %v1818_v22, %v4982_v8  ;;  %v1930_v8 = vld [vmem:[#allocation5 + $0xf8] sm:$0xff]  ;;  %v2123_v22 = vld [vmem:[#allocation5 + $0x160] sm:$0xff] }
 0xbe1   : > { %v4477_v41 = vpack.c.bf16 %v1931_v40, %v1930_v8  ;;  %v4489_v23 = vpack.c.bf16 %v2123_v22, %v2122_v24 }
 0xbe2   : > { %v1824_v26 = vsel %vm285_vm2, %v1821_v25, 0.0 }
 0xbe3   : > { %1825 = vadd.xlane.f32.xlu0 %v1824_v26  ;;  %4478 = vmatpush3.bf16.msra.mxu1 %v4477_v41  ;;  %v2125_v26 = vld [vmem:[#allocation5 + $0x170] sm:$0xff] }
 0xbe4   : > { %4479 = vmatprep.subr.bf16.mxu1 %v4780_v9 }
 0xbe7   : > { %4481 = vmatpush3.bf16.msra.mxu1 %v4480_v50 }
 0xbe8   : > { %4488 = vmatprep.subr.bf16.mxu1 %v4780_v9 }
 0xc70   : > { %v1826_v28 = vpop.xlane.xlu0 %1825 }
 0xc71   : > { %v1827_v29 = vmul.f32 0.03125, %v1826_v28 }
 0xc73   : > { %v1828_v30 = vsub.f32 %v1821_v25, %v1827_v29  ;;  %v2124_v25 = vld [vmem:[#allocation5 + $0x168] sm:$0xff] }
 0xc74   : > { %v4492_v28 = vpack.c.bf16 %v2125_v26, %v2124_v25 }
 0xc75   : > { %v1829_v31 = vmul.f32 %v1828_v30, %v1828_v30 }
 0xc77   : > { %v1830_v32 = vsel %vm285_vm2, %v1829_v31, 0.0 }
 0xc78   : > { %1831 = vadd.xlane.f32.xlu1 %v1830_v32 }
 0xd05   : > { %v1832_v42 = vpop.xlane.xlu1 %1831 }
 0xd06   : > { %v1833_v15 = vmul.f32 0.03125, %v1832_v42 }
 0xd08   : > { %v1834_v17 = vadd.f32 1e-05, %v1833_v15 }
 0xd0a   : > { %4618 = vrsqrt.f32 %v1834_v17 }
 0xd14   : > { %v4619_v43 = vpop.eup %4618 }
 0xd15   : > { %v1836_v44 = vmul.f32 %v4619_v43, %v1828_v30 }
 0xd17   : > { %v1841_v46 = vmul.f32 %v4085_v16, %v1836_v44 }
 0xd19   : > { %v1846_v47 = vadd.f32 %v4086_v45, %v1841_v46 }
 0xd1b   : > { %4319 = vmatmul.mubr.msk.f32.vlgmr.msra.gmra.mrb[12].mxu0 %vm285_vm2, %v1846_v47 }
 0xd1c   : > { %4340 = vmatprep.mubr.msk.f32.mxu0 %vm4781_vm1, %v4782_v11  ;;  %4484 = vmatpush3.bf16.msra.mxu0 %v4483_v53 }
 0xd1d   : > { %4485 = vmatprep.subr.bf16.mxu0 %v4780_v9 }
 0xd20   : > { %4487 = vmatpush3.bf16.msra.mxu0 %v4486_v61 }
 0xd21   : > { %4354 = vmatprep.subr.mxu0 %v4782_v11 }
 0xdee   : > { %v1925_v55 = vpop.f32.mrb[12].mxu0 }
 0xdef   : > { %v1926_v56 = vadd.f32 %v4087_v54, %v1925_v55  ;;  %v4320_v57 = vpop.f32.mrb[13].mxu0 }
 0xdf1   : > { %v1929_v58 = vmax.f32 %v1926_v56, 0.0 }
 0xdf3   : > { %4330 = vmatmul.mubr.msk.f32.vlgmr.msra.gmra.mrb[12].mxu1 %vm285_vm2, %v1929_v58 }
 0xdf4   : > { %4351 = vmatprep.mubr.msk.f32.mxu1 %vm4781_vm1, %v4782_v11  ;;  %4490 = vmatpush3.bf16.msra.mxu1 %v4489_v23 }
 0xdf5   : > { %4491 = vmatprep.subr.bf16.mxu1 %v4780_v9 }
 0xdf8   : > { %4493 = vmatpush3.bf16.msra.mxu1 %v4492_v28 }
 0xdf9   : > { %4364 = vmatprep.subr.mxu1 %v4782_v11 }
 0xec6   : > { %v2008_v63 = vpop.f32.mrb[12].mxu1 }
 0xec7   : > { %v2009_v0 = vadd.f32 %v4089_v62, %v2008_v63  ;;  %v4331_v1 = vpop.f32.mrb[13].mxu1 }
 0xec9   : > { %v2012_v2 = vmax.f32 %v2009_v0, 0.0 }
 0xecb   : > { %4341 = vmatmul.mubr.msk.f32.vlgmr.msra.gmra.mrb[14].mxu0 %vm285_vm2, %v2012_v2 }
 0xecc   : > { %4356 = vmatprep.mubr.msk.f32.mxu0 %vm4781_vm1, %v4782_v11 }
 0xf9e   : > { %v2091_v4 = vpop.f32.mrb[14].mxu0 }
 0xf9f   : > { %v2092_v5 = vadd.f32 %v4091_v3, %v2091_v4  ;;  %v4342_v6 = vpop.f32.mrb[15].mxu0 }
 0xfa1   : > { %v2095_v7 = vmax.f32 %v2092_v5, 0.0 }
 0xfa3   : > { %v2096_v10 = vadd.f32 %v2095_v7, %v1846_v47 }
 0xfa5   : > { %v2099_v12 = vsel %vm285_vm2, %v2096_v10, 0.0 }
 0xfa6   : > { %2100 = vadd.xlane.f32.xlu0 %v2099_v12 }
0x1033   : > { %v2101_v14 = vpop.xlane.xlu0 %2100 }
0x1034   : > { %v2102_v18 = vmul.f32 0.03125, %v2101_v14 }
0x1036   : > { %v2103_v19 = vsub.f32 %v2096_v10, %v2102_v18 }
0x1038   : > { %v2104_v21 = vmul.f32 %v2103_v19, %v2103_v19 }
0x103a   : > { %v2105_v13 = vsel %vm285_vm2, %v2104_v21, 0.0 }
0x103b   : > { %2106 = vadd.xlane.f32.xlu0 %v2105_v13 }
0x10c8   : > { %v2107_v29 = vpop.xlane.xlu0 %2106 }
0x10c9   : > { %v2108_v30 = vmul.f32 0.03125, %v2107_v29 }
0x10cb   : > { %v2109_v31 = vadd.f32 1e-05, %v2108_v30 }
0x10cd   : > { %4620 = vrsqrt.f32 %v2109_v31 }
0x10d7   : > { %v4621_v32 = vpop.eup %4620 }
0x10d8   : > { %v2111_v34 = vmul.f32 %v4621_v32, %v2103_v19 }
0x10da   : > { %v2116_v37 = vmul.f32 %v4093_v33, %v2111_v34 }
0x10dc   : > { %v5188_v38 = vadd.f32 %v4094_v35, %v2116_v37 }
0x10de   : > { %4352 = vmatmul.mubr.msk.f32.vlgmr.msra.gmra.mrb[14].mxu1 %vm285_vm2, %v5188_v38  ;;  %3939 = vst.msk [vmem:[%s5194_s4] sm:$0xff] %vm285_vm2, %v5188_v38 }
0x10df   : > { %4366 = vmatprep.mubr.msk.f32.mxu1 %vm4781_vm1, %v4782_v11 }
0x11b1   : > { %v2200_v8 = vpop.f32.mrb[14].mxu1 }
0x11b2   : > { %v5201_v40 = vadd.f32 %v4095_v39, %v2200_v8  ;;  %v4353_v41 = vpop.f32.mrb[15].mxu1 }
0x11b4   : > { %2208 = vrot.lane.b32.xlu1 %v5201_v40, %s4783_s15  ;;  %2205 = vrot.lane.b32.xlu0 %v5201_v40, %s4784_s17 }
0x11b8   : > { %2211 = vrot.lane.b32.xlu1 %v5201_v40, %s4785_s27 }
0x11bc   : > { %2350 = vrot.lane.b32.xlu1 %v5201_v40, %s4786_s22 }
0x1226   : > { %v5211_v42 = vpop.permute.xlu1 %2208  ;;  %v5213_v15 = vpop.permute.xlu0 %2205 }
0x1227   : > { %2354 = vrot.lane.b32.xlu1 %v5211_v42, %s4786_s22  ;;  %2352 = vrot.lane.b32.xlu0 %v5213_v15, %s4786_s22  ;;  %v2214_v44 = vcombine.low %v5201_v40, %v5211_v42  ;;  %v2215_v45 = vcombine.high %v5201_v40, %v5211_v42 }
0x1229   : > { %v2222_v49 = vrot.slane %v2214_v44, %v5015_v27  ;;  %v2229_v50 = vrot.slane %v2215_v45, %v5015_v27 }
0x122a   : > { %v5219_v17 = vpop.permute.xlu1 %2211 }
0x122b   : > { %2356 = vrot.lane.b32.xlu0 %v5219_v17, %s4786_s22  ;;  %v2230_v43 = vcombine.low %v5213_v15, %v5219_v17  ;;  %v2231_v16 = vcombine.high %v5213_v15, %v5219_v17 }
0x122d   : > { %v2238_v46 = vrot.slane %v2230_v43, %v5015_v27  ;;  %v2245_v47 = vrot.slane %v2231_v16, %v5015_v27 }
0x122e   : > { %v2351_v48 = vpop.permute.xlu1 %2350 }
0x122f   : > { %v2246_v51 = vcombine.low %v2222_v49, %v2238_v46  ;;  %v2247_v52 = vcombine.high %v2222_v49, %v2238_v46  ;;  %v2262_v53 = vcombine.low %v2229_v50, %v2245_v47  ;;  %v2263_v54 = vcombine.high %v2229_v50, %v2245_v47 }
0x1231   : > { %v2254_v59 = vrot.slane %v2246_v51, %v5025_v36  ;;  %v2261_v60 = vrot.slane %v2247_v52, %v5025_v36  ;;  %v2270_v61 = vrot.slane %v2262_v53, %v5025_v36  ;;  %v2277_v62 = vrot.slane %v2263_v54, %v5025_v36 }
0x1233   : > { %v2282_v6 = vcombine.low %v2254_v59, %v2261_v60  ;;  %v4097_v7 = vcombine.high %v2254_v59, %v2261_v60  ;;  %v2298_v10 = vcombine.low %v2270_v61, %v2277_v62  ;;  %v4098_v12 = vcombine.high %v2270_v61, %v2277_v62 }
0x1235   : > { %v2289_v25 = vrot.slane %v2282_v6, %v5015_v27  ;;  %v2297_v26 = vrot.slane %v4097_v7, %v5015_v27  ;;  %v2305_v28 = vrot.slane %v2298_v10, %v5015_v27  ;;  %v2313_v29 = vrot.slane %v4098_v12, %v5015_v27 }
0x1237   : > { %v2314_v8 = vcombine.low %v2289_v25, %v2297_v26  ;;  %v2330_v41 = vcombine.low %v2305_v28, %v2313_v29  ;;  %v2315_v43 = vcombine.high %v2289_v25, %v2297_v26  ;;  %v2331_v16 = vcombine.high %v2305_v28, %v2313_v29 }
0x1239   : > { %v2322_v52 = vrot.slane %v2314_v8, %v5025_v36  ;;  %v2338_v53 = vrot.slane %v2330_v41, %v5025_v36  ;;  %v2329_v54 = vrot.slane %v2315_v43, %v5025_v36 }
0x123b   : > { %v2347_v61 = vcombine.high %v2322_v52, %v2338_v53 }
0x1299   : > { %v2355_v55 = vpop.permute.xlu1 %2354  ;;  %v2353_v56 = vpop.permute.xlu0 %2352 }
0x129a   : > { %v2362_v57 = vcombine.low %v2351_v48, %v2355_v55  ;;  %v2363_v58 = vcombine.high %v2351_v48, %v2355_v55  ;;  %v2345_v55 = vrot.slane %v2331_v16, %v5025_v36 }
0x129c   : > { %v2370_v2 = vrot.slane %v2362_v57, %v5015_v27  ;;  %v2377_v3 = vrot.slane %v2363_v58, %v5015_v27  ;;  %v2346_v58 = vcombine.low %v2322_v52, %v2338_v53  ;;  %v2348_v59 = vcombine.low %v2329_v54, %v2345_v55 }
0x129d   : > { %v2357_v63 = vpop.permute.xlu0 %2356 }
0x129e   : > { %v2378_v0 = vcombine.low %v2353_v56, %v2357_v63  ;;  %v2379_v1 = vcombine.high %v2353_v56, %v2357_v63  ;;  %v2349_v63 = vcombine.high %v2329_v54, %v2345_v55 }
0x12a0   : > { %v2386_v4 = vrot.slane %v2378_v0, %v5015_v27  ;;  %v2393_v5 = vrot.slane %v2379_v1, %v5015_v27 }
0x12a2   : > { %v2394_v14 = vcombine.low %v2370_v2, %v2386_v4  ;;  %v2395_v18 = vcombine.high %v2370_v2, %v2386_v4  ;;  %v2410_v19 = vcombine.low %v2377_v3, %v2393_v5  ;;  %v2411_v21 = vcombine.high %v2377_v3, %v2393_v5 }
0x12a4   : > { %v2402_v13 = vrot.slane %v2394_v14, %v5025_v36  ;;  %v2409_v24 = vrot.slane %v2395_v18, %v5025_v36  ;;  %v2418_v22 = vrot.slane %v2410_v19, %v5025_v36  ;;  %v2425_v23 = vrot.slane %v2411_v21, %v5025_v36 }
0x12a6   : > { %v2430_v30 = vcombine.low %v2402_v13, %v2409_v24  ;;  %v4099_v31 = vcombine.high %v2402_v13, %v2409_v24  ;;  %v2446_v32 = vcombine.low %v2418_v22, %v2425_v23  ;;  %v4100_v33 = vcombine.high %v2418_v22, %v2425_v23 }
0x12a8   : > { %v2437_v34 = vrot.slane %v2430_v30, %v5015_v27  ;;  %v2445_v35 = vrot.slane %v4099_v31, %v5015_v27  ;;  %v2453_v37 = vrot.slane %v2446_v32, %v5015_v27  ;;  %v2461_v39 = vrot.slane %v4100_v33, %v5015_v27 }
0x12aa   : > { %v2462_v44 = vcombine.low %v2437_v34, %v2445_v35  ;;  %v2463_v45 = vcombine.high %v2437_v34, %v2445_v35  ;;  %v2478_v46 = vcombine.low %v2453_v37, %v2461_v39  ;;  %v2479_v47 = vcombine.high %v2453_v37, %v2461_v39 }
0x12ac   : > { %v2470_v48 = vrot.slane %v2462_v44, %v5025_v36  ;;  %v2486_v49 = vrot.slane %v2478_v46, %v5025_v36  ;;  %v2477_v50 = vrot.slane %v2463_v45, %v5025_v36  ;;  %v2493_v51 = vrot.slane %v2479_v47, %v5025_v36 }
0x12ae   : > { %v2494_v56 = vcombine.low %v2470_v48, %v2486_v49  ;;  %v2496_v57 = vcombine.low %v2477_v50, %v2493_v51  ;;  %v2495_v60 = vcombine.high %v2470_v48, %v2486_v49  ;;  %v2497_v62 = vcombine.high %v2477_v50, %v2493_v51 }
0x12b0   : > { %4355 = vmatpush3.xpose.msk.msra.mxu0 %vm942_vm3, %v2494_v56  ;;  %4365 = vmatpush3.xpose.msk.msra.mxu1 %vm942_vm3, %v2496_v57 }
0x12b1   : > { %4359 = vmatprep.subr.mxu0 %v4782_v11  ;;  %4374 = vmatprep.subr.mxu1 %v4782_v11 }
0x12b3   : > { %4357 = vmatmul.mubr.msk.f32.vlgmr.msra.gmra.mrb[16].mxu0 %vm942_vm3, %v2346_v58  ;;  %4367 = vmatmul.mubr.msk.f32.vlgmr.msra.gmra.mrb[16].mxu1 %vm942_vm3, %v2348_v59 }
0x12b4   : > { %4360 = vmatpush3.xpose.msk.msra.mxu0 %vm942_vm3, %v2495_v60  ;;  %4361 = vmatprep.mubr.msk.f32.mxu0 %vm4781_vm1, %v4782_v11 }
0x12b5   : > { %4369 = vmatprep.subr.mxu0 %v4782_v11  ;;  %4376 = vmatprep.mubr.msk.f32.mxu1 %vm4781_vm1, %v4782_v11 }
0x12b7   : > { %4362 = vmatmul.mubr.msk.f32.vlgmr.msra.gmra.mrb[18].mxu0 %vm942_vm3, %v2347_v61 }
0x12b8   : > { %4370 = vmatpush3.xpose.msk.msra.mxu0 %vm942_vm3, %v2497_v62  ;;  %4371 = vmatprep.mubr.msk.f32.mxu0 %vm4781_vm1, %v4782_v11 }
0x12b9   : > { %4379 = vmatprep.subr.mxu0 %v4782_v11 }
0x12bb   : > { %4372 = vmatmul.mubr.msk.f32.vlgmr.msra.gmra.mrb[20].mxu0 %vm942_vm3, %v2349_v63 }
0x12bc   : > { %4381 = vmatprep.mubr.msk.f32.mxu0 %vm4781_vm1, %v4782_v11 }
0x1386   : > { %v2718_v0 = vpop.f32.mrb[16].mxu0  ;;  %v2870_v1 = vpop.f32.mrb[16].mxu1 }
0x1387   : > { %v2950_v2 = vmul.f32 0.35355338, %v2718_v0  ;;  %v2952_v3 = vmul.f32 0.35355338, %v2870_v1  ;;  %v4358_v4 = vpop.f32.mrb[17].mxu0  ;;  %v4368_v5 = vpop.f32.mrb[17].mxu1 }
0x1389   : > { %v2960_v6 = vsel %vm942_vm3, %v2952_v3, -inf  ;;  %v2954_v7 = vsel %vm942_vm3, %v2950_v2, -inf }
0x138a   : > { %2961 = vmax.xlane.f32.xlu0 %v2960_v6  ;;  %2955 = vmax.xlane.f32.xlu1 %v2954_v7  ;;  %v2794_v10 = vpop.f32.mrb[18].mxu0 }
0x138b   : > { %v2951_v12 = vmul.f32 0.35355338, %v2794_v10  ;;  %v4363_v14 = vpop.f32.mrb[19].mxu0 }
0x138d   : > { %v2957_v18 = vsel %vm942_vm3, %v2951_v12, -inf }
0x138e   : > { %2958 = vmax.xlane.f32.xlu0 %v2957_v18  ;;  %v2946_v19 = vpop.f32.mrb[20].mxu0 }
0x138f   : > { %v2953_v21 = vmul.f32 0.35355338, %v2946_v19  ;;  %v4373_v13 = vpop.f32.mrb[21].mxu0 }
0x1391   : > { %v2963_v24 = vsel %vm942_vm3, %v2953_v21, -inf }
0x1392   : > { %2964 = vmax.xlane.f32.xlu0 %v2963_v24 }
0x139b   : > { %2498 = vrot.lane.b32.xlu1 %v5201_v40, %s4789_s23 }
0x1417   : > { %v2962_v22 = vpop.xlane.xlu0 %2961  ;;  %v2956_v23 = vpop.xlane.xlu1 %2955 }
0x1418   : > { %v2968_v25 = vsub.f32 %v2952_v3, %v2962_v22  ;;  %v2966_v26 = vsub.f32 %v2950_v2, %v2956_v23 }
0x141a   : > { %v2970_v28 = vmul.f32 1.442695, %v2966_v26  ;;  %v2974_v29 = vmul.f32 1.442695, %v2968_v25 }
0x141b   : > { %v2959_v30 = vpop.xlane.xlu0 %2958  ;;  %v2499_v45 = vpop.permute.xlu1 %2498 }
0x141c   : > { %v2967_v31 = vsub.f32 %v2951_v12, %v2959_v30  ;;  %4622 = vpow2.f32 %v2970_v28 }
0x141d   : > { %4624 = vpow2.f32 %v2974_v29 }
0x141e   : > { %v2972_v32 = vmul.f32 1.442695, %v2967_v31 }
0x141f   : > { %v2965_v33 = vpop.xlane.xlu0 %2964 }
0x1420   : > { %4626 = vpow2.f32 %v2972_v32  ;;  %v2969_v34 = vsub.f32 %v2953_v21, %v2965_v33 }
0x1422   : > { %v2976_v35 = vmul.f32 1.442695, %v2969_v34 }
0x1424   : > { %4628 = vpow2.f32 %v2976_v35 }
0x1426   : > { %v5289_v37 = vpop.eup %4622 }
0x1427   : > { %v2978_v40 = vsel %vm942_vm3, %v5289_v37, 0.0  ;;  %v5293_v39 = vpop.eup %4624 }
0x1428   : > { %2979 = vadd.xlane.f32.xlu1 %v2978_v40  ;;  %v2984_v43 = vsel %vm942_vm3, %v5293_v39, 0.0 }
0x142a   : > { %v4627_v8 = vpop.eup %4626 }
0x142b   : > { %v2981_v41 = vsel %vm942_vm3, %v4627_v8, 0.0 }
0x142c   : > { %2982 = vadd.xlane.f32.xlu0 %v2981_v41  ;;  %2985 = vadd.xlane.f32.xlu1 %v2984_v43 }
0x142e   : > { %v5298_v16 = vpop.eup %4628 }
0x142f   : > { %v2987_v44 = vsel %vm942_vm3, %v5298_v16, 0.0 }
0x1430   : > { %2988 = vadd.xlane.f32.xlu0 %v2987_v44 }
0x143d   : > { %2502 = vrot.lane.b32.xlu1 %v5211_v42, %s4789_s23 }
0x1441   : > { %2504 = vrot.lane.b32.xlu1 %v5219_v17, %s4789_s23 }
0x1446   : > { %2500 = vrot.lane.b32.xlu0 %v5213_v15, %s4789_s23 }
0x14b5   : > { %v2980_v46 = vpop.xlane.xlu1 %2979 }
0x14b6   : > { %4630 = vrcp.f32 %v2980_v46 }
0x14b9   : > { %v2983_v47 = vpop.xlane.xlu0 %2982  ;;  %v2986_v48 = vpop.xlane.xlu1 %2985 }
0x14ba   : > { %4632 = vrcp.f32 %v2983_v47 }
0x14bb   : > { %4634 = vrcp.f32 %v2986_v48 }
0x14bd   : > { %v2989_v49 = vpop.xlane.xlu0 %2988  ;;  %v2503_v50 = vpop.permute.xlu1 %2502 }
0x14be   : > { %v2510_v51 = vcombine.low %v2499_v45, %v2503_v50  ;;  %v2511_v52 = vcombine.high %v2499_v45, %v2503_v50  ;;  %4636 = vrcp.f32 %v2989_v49 }
0x14c0   : > { %v2518_v42 = vrot.slane %v2510_v51, %v5015_v27  ;;  %v2525_v57 = vrot.slane %v2511_v52, %v5015_v27  ;;  %v4631_v19 = vpop.eup %4630 }
0x14c1   : > { %v2501_v53 = vpop.permute.xlu0 %2500  ;;  %v2505_v54 = vpop.permute.xlu1 %2504  ;;  %v2991_v31 = vmul.f32 %v4631_v19, %v5289_v37  ;;  %v3441_v37 = vld [vmem:[#allocation5 + $0x180] sm:$0xff] }
0x14c2   : > { %v2526_v55 = vcombine.low %v2501_v53, %v2505_v54  ;;  %v2527_v56 = vcombine.high %v2501_v53, %v2505_v54 }
0x14c4   : > { %v2534_v17 = vrot.slane %v2526_v55, %v5015_v27  ;;  %v2541_v15 = vrot.slane %v2527_v56, %v5015_v27  ;;  %v4633_v22 = vpop.eup %4632 }
0x14c5   : > { %v4635_v30 = vpop.eup %4634  ;;  %v2993_v32 = vmul.f32 %v4633_v22, %v4627_v8 }
0x14c6   : > { %v2542_v58 = vcombine.low %v2518_v42, %v2534_v17  ;;  %v2543_v59 = vcombine.high %v2518_v42, %v2534_v17  ;;  %v2558_v60 = vcombine.low %v2525_v57, %v2541_v15  ;;  %v2559_v61 = vcombine.high %v2525_v57, %v2541_v15 }
0x14c7   : > { %v2995_v40 = vmul.f32 %v4635_v30, %v5293_v39  ;;  %v3442_v39 = vld [vmem:[#allocation5 + $0x188] sm:$0xff] }
0x14c8   : > { %v2550_v62 = vrot.slane %v2542_v58, %v5025_v36  ;;  %v2557_v63 = vrot.slane %v2543_v59, %v5025_v36  ;;  %v2566_v0 = vrot.slane %v2558_v60, %v5025_v36  ;;  %v2573_v1 = vrot.slane %v2559_v61, %v5025_v36  ;;  %v4637_v33 = vpop.eup %4636  ;;  %v3443_v59 = vld [vmem:[#allocation5 + $0x190] sm:$0xff]  ;;  %v3444_v60 = vld [vmem:[#allocation5 + $0x198] sm:$0xff] }
0x14c9   : > { %v2997_v41 = vmul.f32 %v4637_v33, %v5298_v16  ;;  %v4495_v8 = vpack.c.bf16 %v3442_v39, %v3441_v37 }
0x14ca   : > { %v2578_v2 = vcombine.low %v2550_v62, %v2557_v63  ;;  %v4101_v3 = vcombine.high %v2550_v62, %v2557_v63  ;;  %v2594_v4 = vcombine.low %v2566_v0, %v2573_v1  ;;  %v4102_v5 = vcombine.high %v2566_v0, %v2573_v1 }
0x14cb   : > { %v4498_v1 = vpack.c.bf16 %v3444_v60, %v3443_v59  ;;  %v3634_v60 = vld [vmem:[#allocation5 + $0x1f0] sm:$0xff] }
0x14cc   : > { %v2585_v6 = vrot.slane %v2578_v2, %v5015_v27  ;;  %v2593_v7 = vrot.slane %v4101_v3, %v5015_v27  ;;  %v2601_v10 = vrot.slane %v2594_v4, %v5015_v27  ;;  %v2609_v12 = vrot.slane %v4102_v5, %v5015_v27 }
0x14ce   : > { %v2610_v14 = vcombine.low %v2585_v6, %v2593_v7  ;;  %v2611_v18 = vcombine.high %v2585_v6, %v2593_v7  ;;  %v2626_v21 = vcombine.low %v2601_v10, %v2609_v12  ;;  %v2627_v13 = vcombine.high %v2601_v10, %v2609_v12 }
0x14d0   : > { %v2618_v24 = vrot.slane %v2610_v14, %v5025_v36  ;;  %v2634_v23 = vrot.slane %v2626_v21, %v5025_v36  ;;  %v2625_v25 = vrot.slane %v2611_v18, %v5025_v36  ;;  %v2641_v26 = vrot.slane %v2627_v13, %v5025_v36 }
0x14d2   : > { %v2642_v28 = vcombine.low %v2618_v24, %v2634_v23  ;;  %v2643_v29 = vcombine.high %v2618_v24, %v2634_v23  ;;  %v2644_v34 = vcombine.low %v2625_v25, %v2641_v26  ;;  %v2645_v35 = vcombine.high %v2625_v25, %v2641_v26 }
0x14d4   : > { %4375 = vmatpush3.msra.mxu1 %v2642_v28  ;;  %4380 = vmatpush3.msra.mxu0 %v2643_v29 }
0x14d5   : > { %4377 = vmatmul.mubr.msk.f32.vlgmr.msra.gmra.mrb[18].mxu1 %vm942_vm3, %v2991_v31  ;;  %4382 = vmatmul.mubr.msk.f32.vlgmr.msra.gmra.mrb[22].mxu0 %vm942_vm3, %v2993_v32 }
0x14d6   : > { %4384 = vmatprep.subr.mxu1 %v4782_v11  ;;  %4389 = vmatprep.subr.mxu0 %v4782_v11 }
0x14d7   : > { %4385 = vmatpush3.msra.mxu1 %v2644_v34  ;;  %4390 = vmatpush3.msra.mxu0 %v2645_v35 }
0x14d8   : > { %4386 = vmatprep.mubr.msk.f32.mxu1 %vm4781_vm1, %v4782_v11  ;;  %4391 = vmatprep.mubr.msk.f32.mxu0 %vm4781_vm1, %v4782_v11 }
0x14d9   : > { %4387 = vmatmul.mubr.msk.f32.vlgmr.msra.gmra.mrb[20].mxu1 %vm942_vm3, %v2995_v40  ;;  %4392 = vmatmul.mubr.msk.f32.vlgmr.msra.gmra.mrb[24].mxu0 %vm942_vm3, %v2997_v41 }
0x14da   : > { %4494 = vmatprep.subr.bf16.mxu1 %v4780_v9  ;;  %4402 = vmatprep.mubr.msk.f32.mxu1 %vm4781_vm1, %v4782_v11 }
0x14db   : > { %4500 = vmatprep.subr.bf16.mxu0 %v4780_v9  ;;  %4413 = vmatprep.mubr.msk.f32.mxu0 %vm4781_vm1, %v4782_v11 }
0x14dc   : > { %4496 = vmatpush3.bf16.msra.mxu1 %v4495_v8 }
0x14dd   : > { %4497 = vmatprep.subr.bf16.mxu1 %v4780_v9 }
0x14e0   : > { %4499 = vmatpush3.bf16.msra.mxu1 %v4498_v1 }
0x14e1   : > { %4506 = vmatprep.subr.bf16.mxu1 %v4780_v9 }
0x15a8   : > { %v3067_v43 = vpop.f32.mrb[18].mxu1  ;;  %v3140_v16 = vpop.f32.mrb[22].mxu0 }
0x15a9   : > { %v4378_v44 = vpop.f32.mrb[19].mxu1  ;;  %v4383_v45 = vpop.f32.mrb[23].mxu0 }
0x15ac   : > { %v3213_v46 = vpop.f32.mrb[20].mxu1  ;;  %v3286_v47 = vpop.f32.mrb[24].mxu0 }
0x15ad   : > { %v3290_v48 = vcombine.low %v3067_v43, %v3213_v46  ;;  %v3291_v49 = vcombine.high %v3067_v43, %v3213_v46  ;;  %v3306_v50 = vcombine.low %v3140_v16, %v3286_v47  ;;  %v3307_v51 = vcombine.high %v3140_v16, %v3286_v47  ;;  %v4388_v52 = vpop.f32.mrb[21].mxu1  ;;  %v4393_v53 = vpop.f32.mrb[25].mxu0  ;;  %v3549_v46 = vld [vmem:[#allocation5 + $0x1b8] sm:$0xff]  ;;  %v3550_v47 = vld [vmem:[#allocation5 + $0x1c0] sm:$0xff] }
0x15ae   : > { %v3633_v52 = vld [vmem:[#allocation5 + $0x1e8] sm:$0xff] }
0x15af   : > { %v3298_v54 = vrot.slane %v3290_v48, %v5015_v27  ;;  %v3305_v55 = vrot.slane %v3291_v49, %v5015_v27  ;;  %v3314_v56 = vrot.slane %v3306_v50, %v5015_v27  ;;  %v3321_v42 = vrot.slane %v3307_v51, %v5015_v27  ;;  %v3551_v49 = vld [vmem:[#allocation5 + $0x1c8] sm:$0xff]  ;;  %v3552_v50 = vld [vmem:[#allocation5 + $0x1d0] sm:$0xff] }
0x15b0   : > { %v4501_v48 = vpack.c.bf16 %v3550_v47, %v3549_v46  ;;  %v4504_v51 = vpack.c.bf16 %v3552_v50, %v3551_v49  ;;  %v4128_v46 = vld [vmem:[#allocation5 + $0x238] ss:$0 sm:$0xff]  ;;  %v4129_v49 = vld [vmem:[#allocation5 + $0x260] ss:$0 sm:$0xff] }
0x15b1   : > { %v3322_v57 = vcombine.low %v3298_v54, %v3314_v56  ;;  %v3323_v17 = vcombine.high %v3298_v54, %v3314_v56  ;;  %v3338_v15 = vcombine.low %v3305_v55, %v3321_v42  ;;  %v3339_v58 = vcombine.high %v3305_v55, %v3321_v42 }
0x15b2   : > { %4502 = vmatpush3.bf16.msra.mxu0 %v4501_v48 }
0x15b3   : > { %v3330_v61 = vrot.slane %v3322_v57, %v5025_v36  ;;  %v3337_v62 = vrot.slane %v3323_v17, %v5025_v36  ;;  %v3346_v63 = vrot.slane %v3338_v15, %v5025_v36  ;;  %v3353_v0 = vrot.slane %v3339_v58, %v5025_v36  ;;  %4503 = vmatprep.subr.bf16.mxu0 %v4780_v9  ;;  %v4119_v57 = vld [vmem:[#allocation5 + $0x1a8] ss:$0 sm:$0xff]  ;;  %v4120_v15 = vld [vmem:[#allocation5 + $0x1b0] ss:$0 sm:$0xff] }
0x15b5   : > { %v3358_v2 = vcombine.low %v3330_v61, %v3337_v62  ;;  %v4115_v3 = vcombine.high %v3330_v61, %v3337_v62  ;;  %v3374_v4 = vcombine.low %v3346_v63, %v3353_v0  ;;  %v4116_v5 = vcombine.high %v3346_v63, %v3353_v0  ;;  %v3635_v61 = vld [vmem:[#allocation5 + $0x1f8] sm:$0xff]  ;;  %v3715_v63 = vld [vmem:[#allocation5 + $0x208] sm:$0xff]  ;;  %v3716_v0 = vld [vmem:[#allocation5 + $0x210] sm:$0xff] }
0x15b6   : > { %4505 = vmatpush3.bf16.msra.mxu0 %v4504_v51  ;;  %v4510_v62 = vpack.c.bf16 %v3635_v61, %v3634_v60  ;;  %v4513_v1 = vpack.c.bf16 %v3716_v0, %v3715_v63 }
0x15b7   : > { %v3365_v6 = vrot.slane %v3358_v2, %v5015_v27  ;;  %v3373_v7 = vrot.slane %v4115_v3, %v5015_v27  ;;  %v3381_v10 = vrot.slane %v3374_v4, %v5015_v27  ;;  %v3389_v12 = vrot.slane %v4116_v5, %v5015_v27  ;;  %4512 = vmatprep.subr.bf16.mxu0 %v4780_v9  ;;  %v4121_v2 = vld [vmem:[#allocation5 + $0x1d8] ss:$0 sm:$0xff] }
0x15b9   : > { %v3391_v14 = vcombine.high %v3365_v6, %v3373_v7  ;;  %v3407_v18 = vcombine.high %v3381_v10, %v3389_v12  ;;  %v3390_v19 = vcombine.low %v3365_v6, %v3373_v7  ;;  %v3406_v21 = vcombine.low %v3381_v10, %v3389_v12  ;;  %v3717_v7 = vld [vmem:[#allocation5 + $0x218] sm:$0xff]  ;;  %v3718_v10 = vld [vmem:[#allocation5 + $0x220] sm:$0xff] }
0x15ba   : > { %v4516_v12 = vpack.c.bf16 %v3718_v10, %v3717_v7 }
0x15bb   : > { %v3405_v13 = vrot.slane %v3391_v14, %v5025_v36  ;;  %v3421_v24 = vrot.slane %v3407_v18, %v5025_v36  ;;  %v3398_v22 = vrot.slane %v3390_v19, %v5025_v36  ;;  %v3414_v23 = vrot.slane %v3406_v21, %v5025_v36  ;;  %v4117_v36 = vld [vmem:[#allocation5 + $0x1a0] ss:$0 sm:$0xff] }
0x15bc   : > { %v4123_v14 = vld [vmem:[#allocation5 + $0x200] ss:$0 sm:$0xff] }
0x15bd   : > { %v3424_v25 = vcombine.low %v3405_v13, %v3421_v24  ;;  %v3423_v26 = vcombine.high %v3398_v22, %v3414_v23  ;;  %v3425_v28 = vcombine.high %v3405_v13, %v3421_v24  ;;  %v3422_v29 = vcombine.low %v3398_v22, %v3414_v23  ;;  %v4125_v24 = vld [vmem:[#allocation5 + $0x228] ss:$0 sm:$0xff] }
0x15bf   : > { %3431 = vrot.lane.b32.xlu0 %v3424_v25, %s4790_s28  ;;  %3427 = vrot.lane.b32.xlu1 %v3423_v26, %s4791_s30 }
0x15c3   : > { %3435 = vrot.lane.b32.xlu1 %v3425_v28, %s4792_s3 }
0x1631   : > { %v3428_v27 = vpop.permute.xlu1 %3427  ;;  %v3432_v30 = vpop.permute.xlu0 %3431 }
0x1632   : > { %v3438_v31 = vsel %vm942_vm3, %v3422_v29, %v3428_v27 }
0x1633   : > { %v3439_v33 = vsel %vm177_vm0, %v3438_v31, %v3432_v30 }
0x1635   : > { %v3436_v32 = vpop.permute.xlu1 %3435 }
0x1636   : > { %v3440_v34 = vsel %vm1737_vm4, %v3439_v33, %v3436_v32 }
0x1637   : > { %4403 = vmatmul.mubr.msk.f32.vlgmr.msra.gmra.mrb[22].mxu1 %vm285_vm2, %v3440_v34  ;;  %v3824_v34 = vld [vmem:[#allocation5 + $0x240] sm:$0xff] }
0x1638   : > { %4424 = vmatprep.mubr.msk.f32.mxu1 %vm4781_vm1, %v4782_v11 }
0x170a   : > { %v3519_v35 = vpop.f32.mrb[22].mxu1 }
0x170b   : > { %v3520_v40 = vadd.f32 %v4117_v36, %v3519_v35  ;;  %v4404_v41 = vpop.f32.mrb[23].mxu1  ;;  %v3825_v36 = vld [vmem:[#allocation5 + $0x248] sm:$0xff] }
0x170c   : > { %v4519_v35 = vpack.c.bf16 %v3825_v36, %v3824_v34  ;;  %v3827_v41 = vld [vmem:[#allocation5 + $0x258] sm:$0xff] }
0x170d   : > { %v3523_v37 = vadd.f32 %v3520_v40, %v5188_v38  ;;  %v3632_v38 = vld [vmem:[#allocation5 + $0x1e0] sm:$0xff]  ;;  %v3826_v40 = vld [vmem:[#allocation5 + $0x250] sm:$0xff] }
0x170e   : > { %v4507_v53 = vpack.c.bf16 %v3633_v52, %v3632_v38  ;;  %v3920_v52 = vand.u32 127, %v515_v20 }
0x170f   : > { %v3526_v39 = vsel %vm285_vm2, %v3523_v37, 0.0 }
0x1710   : > { %3527 = vadd.xlane.f32.xlu0 %v3526_v39  ;;  %4508 = vmatpush3.bf16.msra.mxu1 %v4507_v53 }
0x1711   : > { %4509 = vmatprep.subr.bf16.mxu1 %v4780_v9 }
0x1714   : > { %4511 = vmatpush3.bf16.msra.mxu1 %v4510_v62 }
0x1715   : > { %4518 = vmatprep.subr.bf16.mxu1 %v4780_v9 }
0x179d   : > { %v3528_v8 = vpop.xlane.xlu0 %3527 }
0x179e   : > { %v3529_v43 = vmul.f32 0.03125, %v3528_v8 }
0x17a0   : > { %v3530_v16 = vsub.f32 %v3523_v37, %v3529_v43  ;;  %v4522_v37 = vpack.c.bf16 %v3827_v41, %v3826_v40 }
0x17a2   : > { %v3531_v44 = vmul.f32 %v3530_v16, %v3530_v16 }
0x17a4   : > { %v3532_v45 = vsel %vm285_vm2, %v3531_v44, 0.0  ;;  %v4127_v44 = vld [vmem:[#allocation5 + $0x230] ss:$0 sm:$0xff] }
0x17a5   : > { %3533 = vadd.xlane.f32.xlu1 %v3532_v45 }
0x1832   : > { %v3534_v54 = vpop.xlane.xlu1 %3533 }
0x1833   : > { %v3535_v55 = vmul.f32 0.03125, %v3534_v54 }
0x1835   : > { %v3536_v56 = vadd.f32 1e-05, %v3535_v55 }
0x1837   : > { %4638 = vrsqrt.f32 %v3536_v56 }
0x1841   : > { %v4639_v42 = vpop.eup %4638 }
0x1842   : > { %v3538_v17 = vmul.f32 %v4639_v42, %v3530_v16 }
0x1844   : > { %v3543_v58 = vmul.f32 %v4119_v57, %v3538_v17 }
0x1846   : > { %v3548_v59 = vadd.f32 %v4120_v15, %v3543_v58 }
0x1848   : > { %4414 = vmatmul.mubr.msk.f32.vlgmr.msra.gmra.mrb[26].mxu0 %vm285_vm2, %v3548_v59 }
0x1849   : > { %4435 = vmatprep.mubr.msk.f32.mxu0 %vm4781_vm1, %v4782_v11  ;;  %4514 = vmatpush3.bf16.msra.mxu0 %v4513_v1 }
0x184a   : > { %4515 = vmatprep.subr.bf16.mxu0 %v4780_v9 }
0x184d   : > { %4517 = vmatpush3.bf16.msra.mxu0 %v4516_v12 }
0x191b   : > { %v3627_v3 = vpop.f32.mrb[26].mxu0 }
0x191c   : > { %v3628_v4 = vadd.f32 %v4121_v2, %v3627_v3  ;;  %v4415_v5 = vpop.f32.mrb[27].mxu0 }
0x191e   : > { %v3631_v6 = vmax.f32 %v3628_v4, 0.0 }
0x1920   : > { %4425 = vmatmul.mubr.msk.f32.vlgmr.msra.gmra.mrb[24].mxu1 %vm285_vm2, %v3631_v6 }
0x1921   : > { %4446 = vmatprep.mubr.msk.f32.mxu1 %vm4781_vm1, %v4782_v11  ;;  %4520 = vmatpush3.bf16.msra.mxu1 %v4519_v35 }
0x1922   : > { %4521 = vmatprep.subr.bf16.mxu1 %v4780_v9 }
0x1925   : > { %4523 = vmatpush3.bf16.msra.mxu1 %v4522_v37 }
0x19f3   : > { %v3710_v18 = vpop.f32.mrb[24].mxu1 }
0x19f4   : > { %v3711_v19 = vadd.f32 %v4123_v14, %v3710_v18  ;;  %v4426_v21 = vpop.f32.mrb[25].mxu1 }
0x19f6   : > { %v3714_v13 = vmax.f32 %v3711_v19, 0.0 }
0x19f8   : > { %4436 = vmatmul.mubr.msk.f32.vlgmr.msra.gmra.mrb[28].mxu0 %vm285_vm2, %v3714_v13 }
0x1acb   : > { %v3793_v22 = vpop.f32.mrb[28].mxu0 }
0x1acc   : > { %v3794_v23 = vadd.f32 %v4125_v24, %v3793_v22  ;;  %v4437_v25 = vpop.f32.mrb[29].mxu0 }
0x1ace   : > { %v3797_v26 = vmax.f32 %v3794_v23, 0.0 }
0x1ad0   : > { %v3798_v28 = vadd.f32 %v3797_v26, %v3548_v59 }
0x1ad2   : > { %v3801_v29 = vsel %vm285_vm2, %v3798_v28, 0.0 }
0x1ad3   : > { %3802 = vadd.xlane.f32.xlu0 %v3801_v29 }
0x1b60   : > { %v3803_v27 = vpop.xlane.xlu0 %3802 }
0x1b61   : > { %v3804_v30 = vmul.f32 0.03125, %v3803_v27 }
0x1b63   : > { %v3805_v31 = vsub.f32 %v3798_v28, %v3804_v30 }
0x1b65   : > { %v3806_v32 = vmul.f32 %v3805_v31, %v3805_v31 }
0x1b67   : > { %v3807_v33 = vsel %vm285_vm2, %v3806_v32, 0.0 }
0x1b68   : > { %3808 = vadd.xlane.f32.xlu0 %v3807_v33 }
0x1bf5   : > { %v3809_v39 = vpop.xlane.xlu0 %3808 }
0x1bf6   : > { %v3810_v8 = vmul.f32 0.03125, %v3809_v39 }
0x1bf8   : > { %v3811_v43 = vadd.f32 1e-05, %v3810_v8 }
0x1bfa   : > { %4640 = vrsqrt.f32 %v3811_v43 }
0x1c04   : > { %v4641_v16 = vpop.eup %4640 }
0x1c05   : > { %v3813_v45 = vmul.f32 %v4641_v16, %v3805_v31 }
0x1c07   : > { %v3818_v47 = vmul.f32 %v4127_v44, %v3813_v45 }
0x1c09   : > { %v3823_v48 = vadd.f32 %v4128_v46, %v3818_v47 }
0x1c0b   : > { %4447 = vmatmul.mubr.msk.f32.vlgmr.msra.gmra.mrb[26].mxu1 %vm285_vm2, %v3823_v48 }
0x1cde   : > { %v3902_v50 = vpop.f32.mrb[26].mxu1 }
0x1cdf   : > { %v3903_v51 = vadd.f32 %v4129_v49, %v3902_v50  ;;  %v4448_v38 = vpop.f32.mrb[27].mxu1 }
0x1ce1   : > { %v3907_v9 = vsel %vm3906_vm5, %v3903_v51, -inf }
0x1ce2   : > { %3908 = vmax.xlane.f32.xlu0 %v3907_v9 }
0x1d6f   : > { %v3909_v53 = vpop.xlane.xlu0 %3908 }
0x1d70   : > { %v3910_v54 = vsub.f32 %v3903_v51, %v3909_v53  ;;  %vm3921_vm6 = vcmp.eq.f32.partialorder %v3903_v51, %v3909_v53 }
0x1d71   : > { %v3922_v55 = vsel %vm3921_vm6, %v3920_v52, 5 }
0x1d72   : > { %v3911_v56 = vmul.f32 1.442695, %v3910_v54  ;;  %v3923_v42 = vsel %vm3906_vm5, %v3922_v55, 2147483647 }
0x1d73   : > { %v3925_v57 = vshra.s32 %v3923_v42, 16  ;;  %v3924_v59 = vand.u32 65535, %v3923_v42 }
0x1d74   : > { %4642 = vpow2.f32 %v3911_v56 }
0x1d75   : > { %v3927_v17 = vcvt.s32.f32 %v3925_v57  ;;  %v3926_v61 = vcvt.s32.f32 %v3924_v59 }
0x1d77   : > { %3928 = vmin.xlane.f32.xlu1 %v3927_v17 }
0x1d7e   : > { %v4643_v15 = vpop.eup %4642 }
0x1d7f   : > { %v3913_v58 = vsel %vm3906_vm5, %v4643_v15, 0.0 }
0x1d80   : > { %3914 = vadd.xlane.f32.xlu0 %v3913_v58 }
0x1e04   : > { %v3929_v60 = vpop.xlane.xlu1 %3928 }
0x1e05   : > { %vm3930_vm7 = vcmp.eq.f32.partialorder %v3927_v17, %v3929_v60  ;;  %v3935_v0 = vcvt.f32.s32 %v3929_v60 }
0x1e06   : > { %v3931_v20 = vsel %vm3930_vm7, %v3926_v61, inf }
0x1e07   : > { %3932 = vmin.xlane.f32.xlu1 %v3931_v20  ;;  %v3936_v3 = vshll.u32 %v3935_v0, 16 }
0x1e0d   : > { %v3915_v62 = vpop.xlane.xlu0 %3914 }
0x1e0e   : > { %4644 = vlog2.f32 %v3915_v62 }
0x1e18   : > { %v4645_v63 = vpop.eup %4644 }
0x1e19   : > { %v3917_v1 = vmul.f32 0.6931472, %v4645_v63 }
0x1e1b   : > { %v3918_v5 = vadd.f32 %v3917_v1, %v3909_v53 }
0x1e1d   : > { %v3938_v10 = vsub.f32 %v3909_v53, %v3918_v5 }
0x1e94   : > { %v3933_v2 = vpop.xlane.xlu1 %3932 }
0x1e95   : > { %v3934_v4 = vcvt.f32.s32 %v3933_v2 }
0x1e97   : > { %v3937_v6 = vadd.s32 %v3936_v3, %v3934_v4 }
0x1e99   : > { %v3940_v7 = vcvt.s32.f32 %v3937_v6 }
0x1e9b   : > { %3942 = vst.msk [vmem:[%s5194_s4] sm:$0xff] %vm3941_vm8, %v3940_v7 }
0x1e9c   : > { %3944 = vst.msk [vmem:[%s5194_s4] sm:$0xff] %vm3943_vm9, %v3938_v10 }
0x1e9d   : > { %3946 = vst.msk [vmem:[%s5194_s4] sm:$0xff] %vm3945_vm10, %v4782_v11 }
0x1e9e   : > { %4717 = shalt.err (!%p4714_p7)
}
0x1e9f   : > { %s4718_s20 = scalar_lea.hbm %s5399_s24, 128  ;;  %s4722_s27 = scalar_lea.hbm %s5448_s2, 256 }
0x1ea0   : > { %p4719_p9 = scmp.ne.s32.totalorder %s5399_s24, %s4718_s20  ;;  %p4723_p0 = scmp.lt.u32.totalorder %s5399_s24, %s5448_s2 }
0x1ea1   : > { %p4724_p11 = scmp.lt.u32.totalorder %s4722_s27, %s4718_s20  ;;  %p4726_p4 = scmp.lt.u32.totalorder %s4718_s20, %s5399_s24 }
0x1ea2   : > { %p4720_p2 = pnand %p4719_p9, %p4900_p12 }
0x1ea3   : > { %p4725_p1 = por %p4724_p11, %p4723_p0 }
0x1ea4   : > { %p4721_p5 = pneg %p4720_p2 }
0x1ea5   : > { %p4727_p6 = por %p4726_p4, %p4725_p1 }
0x1ea7   : > { %p4728_p8 = pnand %p4727_p6, %p4721_p5 }
0x1ea9   : > { %4731 = shalt.err (!%p4728_p8)
}
0x1eaa   : > { %4530 = dma.vmem_to_hbm [thread:$0]  (%p4900_p12), %s5401_s6, 128, %s5399_s24, %s3948_s13  }
0x1eab PF: > { %s3973_s28 = sand.u32 1, %s4762_s9   ;;  %p5463_p10 = scmp.ne.s32.totalorder %s5453_s16, 0 }
0x1eac   : > { %p5464_p13 = scmp.ge.s32.totalorder %s4774_s12, 2  ;;  %s3974_s30 = scalar_lea.sflag [#allocation4], %s3973_s28 }
0x1eae   : > { %p4541_p3 = pnand %p5464_p13, %p5463_p10 }
0x1eb0   : > { %4757 = dma.done.wait (!%p4541_p3), %s3974_s30, 128  }
0x1eb1   : > { %4759 = vsyncadd (!%p4541_p3), %s3974_s30, 4294967168  ;;  %p16_p7 = scmp.ge.s32.totalorder %s4865_s21, 4   ;;  %s5465_s9 = smov %s4766_s10 }
0x1eb2   : > { %s5466_s10 = smov %s4770_s11  ;;  %s5467_s11 = smov %s4896_s8 }
0x1eb3   : > { %s5468_s12 = smov %s4865_s21  ;;  %18 = sbr.rel (!%p16_p7) target bundleno = 6 (0x6), region = 77 }
0x1eba   :  { %3979 = vsyncpa [#allocation3], 1 }
0x1ebb   :  { %3981 = vsyncpa [#allocation3 + $0x1], 1 }
0x1ebc   :  { %3982 = vsyncpa [#allocation6], 1 }
0x1ebd   :  { %3983 = vsyncpa [#allocation4], 1 }
0x1ebe   :  { %3985 = vsyncpa [#allocation4 + $0x1], 1 }

</bundles_post_ra>
